<compile_context>
chip_gen: v7x
topology: tpu7x:2x2x1
jax: 0.10.0
libtpu: 0.0.40
codegen_flags: <defaults>
</compile_context>

<pallas_src>
import functools

import jax
import jax.numpy as jnp
import numpy as np
from jax.experimental import pallas as pl
from jax.experimental.pallas import tpu as pltpu


def _silu(x):
    return x * jax.nn.sigmoid(x)


def esp_kernel(x_ref, w1_ref, wd1_ref, wd2_ref, wd4_ref, wd8_ref, wd16_ref,
               w11_ref, s11_ref, b11_ref, s2_ref, b2_ref,
               eca_w_ref, eca_b_ref, o_ref, *,
               H, W, use_add, shifts1, shifts2, shifts4, shifts8, shifts16):
    """One image per grid step. Activations are (C, H*W): spatial on lanes."""
    HW = H * W
    x = x_ref[0].astype(jnp.float32)                       # (Cin, HW)

    # ---- c1: 1x1 conv (Cin -> n) as a single MXU matmul over channels ------
    out1 = jnp.dot(w1_ref[...], x, preferred_element_type=jnp.float32)  # (n, HW)

    # ---- dilated 3x3 convs: taps = static lane shifts of the flat map ------
    col = jax.lax.broadcasted_iota(jnp.int32, (1, HW), 1) % W
    mask_cache = {}

    def col_mask(cw):
        if cw not in mask_cache:
            mask_cache[cw] = jnp.logical_and(col + cw >= 0, col + cw < W)
        return mask_cache[cw]

    def shifted(v, rh, cw):
        # value of v sampled at (h+rh, w+cw), zero outside the image.
        s = rh * W + cw                                    # flat shift (static)
        if s == 0:
            sh = v
        elif s > 0:
            sh = jnp.concatenate(
                [v[:, s:], jnp.zeros((v.shape[0], s), v.dtype)], axis=-1)
        else:
            sh = jnp.concatenate(
                [jnp.zeros((v.shape[0], -s), v.dtype), v[:, :HW + s]], axis=-1)
        if cw != 0:
            sh = jnp.where(col_mask(cw), sh, 0.0)
        return sh

    def dilated_conv(w_ref, shifts):
        # w_ref already holds only the valid taps, columns ordered [tap][cin];
        # build matching stacked activations and do one matmul on the MXU.
        pieces = [shifted(out1, rh, cw) for (rh, cw) in shifts]
        xd = pieces[0] if len(pieces) == 1 else jnp.concatenate(pieces, axis=0)
        return jnp.dot(w_ref[...], xd, preferred_element_type=jnp.float32)

    d1 = dilated_conv(wd1_ref, shifts1)
    d2 = dilated_conv(wd2_ref, shifts2)
    d4 = dilated_conv(wd4_ref, shifts4)
    d8 = dilated_conv(wd8_ref, shifts8)
    d16 = dilated_conv(wd16_ref, shifts16)

    add2 = d2 + d4
    add3 = add2 + d8
    add4 = add3 + d16
    combine = jnp.concatenate([d1, d2, add2, add3, add4], axis=0)  # (nOut, HW)
    n_out = combine.shape[0]

    # ---- ECA attention: GAP over lanes -> k=3 conv over channels -> gate ---
    gap = jnp.mean(combine, axis=-1, keepdims=True)        # (nOut, 1)
    zero = jnp.zeros((1, 1), jnp.float32)
    gpad = jnp.concatenate([zero, gap, zero], axis=0)      # (nOut+2, 1)
    z = (eca_w_ref[0] * gpad[0:n_out, :]
         + eca_w_ref[1] * gpad[1:n_out + 1, :]
         + eca_w_ref[2] * gpad[2:n_out + 2, :]
         + eca_b_ref[0])
    combine = combine * jax.nn.sigmoid(z)

    # ---- conv1_1 (depthwise 1x1 = per-channel scale) -> SiLU -> BN1_1 ------
    combine = s11_ref[...] * _silu(w11_ref[...] * combine) + b11_ref[...]

    if use_add:                                            # requires Cin == nOut
        combine = combine + x

    # ---- final BN -> SiLU, lane-dense full-width store ---------------------
    o_ref[0] = _silu(s2_ref[...] * combine + b2_ref[...]).astype(o_ref.dtype)


def _prep_dilated(w_oihw, d, H, W):
    """Drop taps that only ever touch zero padding; order columns [tap][cin].

    Returns (weight_matrix (o, n_taps*i), shifts tuple of (rh, cw))."""
    o, i, KH, KW = w_oihw.shape
    cols, shifts = [], []
    for kh in range(KH):
        for kw in range(KW):
            rh, cw = (kh - 1) * d, (kw - 1) * d
            if -H < rh < H and -W < cw < W:
                cols.append(w_oihw[:, :, kh, kw])          # (o, i)
                shifts.append((rh, cw))
    w = cols[0] if len(cols) == 1 else jnp.concatenate(cols, axis=1)
    return w, tuple(shifts)


def esp_forward(x_nchw, p, use_add):
    """Wrapper: NCHW in/out; kernel works on (C, H*W) with spatial on lanes."""
    N, Cin, H, W = x_nchw.shape
    HW = H * W
    x = x_nchw.reshape(N, Cin, HW)                         # free row-major reshape

    w1 = p['w1']
    wd1, sh1 = _prep_dilated(p['wd1'], 1, H, W)
    wd2, sh2 = _prep_dilated(p['wd2'], 2, H, W)
    wd4, sh4 = _prep_dilated(p['wd4'], 4, H, W)
    wd8, sh8 = _prep_dilated(p['wd8'], 8, H, W)
    wd16, sh16 = _prep_dilated(p['wd16'], 16, H, W)

    col = lambda v: v.reshape(-1, 1)
    w11, s11, b11 = col(p['w11']), col(p['s11']), col(p['b11'])
    s2, b2 = col(p['s2']), col(p['b2'])
    n_out = w11.shape[0]

    def vmem_full(a):
        return pl.BlockSpec(a.shape, lambda n, _nd=a.ndim: (0,) * _nd)

    smem_spec = pl.BlockSpec(memory_space=pltpu.MemorySpace.SMEM)

    kern = functools.partial(esp_kernel, H=H, W=W, use_add=use_add,
                             shifts1=sh1, shifts2=sh2, shifts4=sh4,
                             shifts8=sh8, shifts16=sh16)
    out = pl.pallas_call(
        kern,
        out_shape=jax.ShapeDtypeStruct((N, n_out, HW), x.dtype),
        grid=(N,),
        in_specs=[
            pl.BlockSpec((1, Cin, HW), lambda n: (n, 0, 0)),
            vmem_full(w1),
            vmem_full(wd1), vmem_full(wd2), vmem_full(wd4),
            vmem_full(wd8), vmem_full(wd16),
            vmem_full(w11), vmem_full(s11), vmem_full(b11),
            vmem_full(s2), vmem_full(b2),
            smem_spec, smem_spec,
        ],
        out_specs=pl.BlockSpec((1, n_out, HW), lambda n: (n, 0, 0)),
        compiler_params=pltpu.CompilerParams(
            dimension_semantics=("parallel",)),
    )(x, w1, wd1, wd2, wd4, wd8, wd16, w11, s11, b11, s2, b2,
      p['eca_w'], p['eca_b'])
    return out.reshape(N, n_out, H, W)


def make_params(key, n_in, n_out):
    """Deterministic synthetic weights; BN folded to per-channel scale/bias."""
    n = n_out // 5
    n1 = n_out - 4 * n
    ks = iter(jax.random.split(key, 24))

    def nrm(shape, scale=0.3):
        return scale * jax.random.normal(next(ks), shape, jnp.float32)

    def bn_fold(c):
        gamma = 1.0 + 0.1 * jax.random.normal(next(ks), (c,), jnp.float32)
        beta = 0.1 * jax.random.normal(next(ks), (c,), jnp.float32)
        mean = 0.1 * jax.random.normal(next(ks), (c,), jnp.float32)
        var = jnp.abs(jax.random.normal(next(ks), (c,), jnp.float32)) + 0.5
        scale = gamma / jnp.sqrt(var + 1e-5)
        return scale, beta - mean * scale

    p = {}
    p['w1'] = nrm((n, n_in))                    # c1: 1x1, (out, in)
    p['wd1'] = nrm((n1, n, 3, 3))               # dilated convs, OIHW
    p['wd2'] = nrm((n, n, 3, 3))
    p['wd4'] = nrm((n, n, 3, 3))
    p['wd8'] = nrm((n, n, 3, 3))
    p['wd16'] = nrm((n, n, 3, 3))
    p['eca_w'] = nrm((3,), 1.0)                 # ECA Conv1d(1,1,3) weight
    p['eca_b'] = nrm((1,), 0.1)                 # ECA Conv1d bias
    p['w11'] = 1.0 + nrm((n_out,), 0.2)         # conv1_1 depthwise 1x1
    p['s11'], p['b11'] = bn_fold(n_out)         # bn1_1 folded
    p['s2'], p['b2'] = bn_fold(n_out)           # bn folded
    return p


def reference_forward(x, p, use_add):
    """Pure-JAX (XLA) reference for correctness checking, NCHW."""
    def dil(xx, w, d):
        return jax.lax.conv_general_dilated(
            xx, w, window_strides=(1, 1), padding=((d, d), (d, d)),
            rhs_dilation=(d, d), dimension_numbers=('NCHW', 'OIHW', 'NCHW'))

    out1 = jnp.einsum('nchw,oc->nohw', x, p['w1'])
    d1 = dil(out1, p['wd1'], 1)
    d2 = dil(out1, p['wd2'], 2)
    d4 = dil(out1, p['wd4'], 4)
    d8 = dil(out1, p['wd8'], 8)
    d16 = dil(out1, p['wd16'], 16)
    add2 = d2 + d4
    add3 = add2 + d8
    add4 = add3 + d16
    combine = jnp.concatenate([d1, d2, add2, add3, add4], axis=1)

    gap = combine.mean(axis=(2, 3))                          # (N, C)
    gpad = jnp.pad(gap, ((0, 0), (1, 1)))
    z = (p['eca_w'][0] * gpad[:, :-2] + p['eca_w'][1] * gpad[:, 1:-1]
         + p['eca_w'][2] * gpad[:, 2:] + p['eca_b'][0])
    combine = combine * jax.nn.sigmoid(z)[:, :, None, None]

    pc = lambda v: v[None, :, None, None]
    combine = pc(p['s11']) * _silu(pc(p['w11']) * combine) + pc(p['b11'])
    if use_add:
        combine = combine + x
    return _silu(pc(p['s2']) * combine + pc(p['b2']))


if __name__ == "__main__":
    key = jax.random.PRNGKey(0)
    k_x, k_p = jax.random.split(key)

    N, C, H, W = 2, 20, 16, 16          # nIn == nOut -> residual add is valid
    x = jax.random.normal(k_x, (N, C, H, W), jnp.float32)
    params = make_params(k_p, n_in=C, n_out=C)

    y = jax.block_until_ready(esp_forward(x, params, use_add=True))
    y_ref = jax.block_until_ready(reference_forward(x, params, True))
    np.testing.assert_allclose(np.asarray(y), np.asarray(y_ref),
                               rtol=5e-3, atol=5e-3)
    print("KERNEL_OK")
</pallas_src>

<mosaic_0001>
module attributes {stable_mosaic.version = 11 : i64} {
  func.func @esp_kernel(%arg0: i32, %arg1: memref<1x20x256xf32, #tpu.memory_space<vmem>>, %arg2: memref<4x20xf32, #tpu.memory_space<vmem>>, %arg3: memref<4x36xf32, #tpu.memory_space<vmem>>, %arg4: memref<4x36xf32, #tpu.memory_space<vmem>>, %arg5: memref<4x36xf32, #tpu.memory_space<vmem>>, %arg6: memref<4x36xf32, #tpu.memory_space<vmem>>, %arg7: memref<4x4xf32, #tpu.memory_space<vmem>>, %arg8: memref<20x1xf32, #tpu.memory_space<vmem>>, %arg9: memref<20x1xf32, #tpu.memory_space<vmem>>, %arg10: memref<20x1xf32, #tpu.memory_space<vmem>>, %arg11: memref<20x1xf32, #tpu.memory_space<vmem>>, %arg12: memref<20x1xf32, #tpu.memory_space<vmem>>, %arg13: memref<3xf32, #tpu.memory_space<smem>>, %arg14: memref<1xf32, #tpu.memory_space<smem>>, %arg15: memref<1x20x256xf32, #tpu.memory_space<vmem>>) attributes {dimension_semantics = [#tpu.dimension_semantics<parallel>], iteration_bounds = array<i64: 2>, scalar_prefetch = 0 : i64, scratch_operands = 0 : i64, tpu.core_type = #tpu.core_type<tc>, window_params = [{transform_indices = @transform_0, window_bounds = array<i64: 1, 20, 256>}, {pipeline_mode = #tpu.pipeline_mode<synchronous>, transform_indices = @transform_1, window_bounds = array<i64: 4, 20>}, {pipeline_mode = #tpu.pipeline_mode<synchronous>, transform_indices = @transform_2, window_bounds = array<i64: 4, 36>}, {pipeline_mode = #tpu.pipeline_mode<synchronous>, transform_indices = @transform_3, window_bounds = array<i64: 4, 36>}, {pipeline_mode = #tpu.pipeline_mode<synchronous>, transform_indices = @transform_4, window_bounds = array<i64: 4, 36>}, {pipeline_mode = #tpu.pipeline_mode<synchronous>, transform_indices = @transform_5, window_bounds = array<i64: 4, 36>}, {pipeline_mode = #tpu.pipeline_mode<synchronous>, transform_indices = @transform_6, window_bounds = array<i64: 4, 4>}, {pipeline_mode = #tpu.pipeline_mode<synchronous>, transform_indices = @transform_7, window_bounds = array<i64: 20, 1>}, {pipeline_mode = #tpu.pipeline_mode<synchronous>, transform_indices = @transform_8, window_bounds = array<i64: 20, 1>}, {pipeline_mode = #tpu.pipeline_mode<synchronous>, transform_indices = @transform_9, window_bounds = array<i64: 20, 1>}, {pipeline_mode = #tpu.pipeline_mode<synchronous>, transform_indices = @transform_10, window_bounds = array<i64: 20, 1>}, {pipeline_mode = #tpu.pipeline_mode<synchronous>, transform_indices = @transform_11, window_bounds = array<i64: 20, 1>}, {transform_indices = @transform_12, window_bounds = array<i64: 3>}, {transform_indices = @transform_13, window_bounds = array<i64: 1>}, {transform_indices = @transform_14, window_bounds = array<i64: 1, 20, 256>}]} {
    %c0 = arith.constant 0 : index
    %c0_0 = arith.constant 0 : index
    %c0_1 = arith.constant 0 : index
    %0 = vector.load %arg1[%c0, %c0_0, %c0_1] : memref<1x20x256xf32, #tpu.memory_space<vmem>>, vector<1x20x256xf32>
    %1 = vector.shape_cast %0 : vector<1x20x256xf32> to vector<20x256xf32>
    %c0_2 = arith.constant 0 : index
    %c0_3 = arith.constant 0 : index
    %2 = vector.load %arg2[%c0_2, %c0_3] : memref<4x20xf32, #tpu.memory_space<vmem>>, vector<4x20xf32>
    %cst = arith.constant dense<0.000000e+00> : vector<4x256xf32>
    %3 = tpu.matmul %2, %1, %cst {dimension_numbers = #tpu.dot_dimension_numbers<[1], [0], [0], [1], [0, 0, 1, 1], [], []>} : vector<4x20xf32>, vector<20x256xf32>, vector<4x256xf32> -> vector<4x256xf32>
    %4 = tpu.iota {dimensions = array<i32: 1>} : vector<1x256xi32>
    %c16_i32 = arith.constant 16 : i32
    %c0_i32 = arith.constant 0 : i32
    %5 = arith.cmpi eq, %c16_i32, %c0_i32 : i32
    %c1_i32 = arith.constant 1 : i32
    %6 = arith.select %5, %c1_i32, %c16_i32 : i32
    %7 = vector.broadcast %6 : i32 to vector<1x256xi32>
    %8 = arith.remsi %4, %7 : vector<1x256xi32>
    %c0_i32_4 = arith.constant 0 : i32
    %9 = vector.broadcast %c0_i32_4 : i32 to vector<1x256xi32>
    %10 = arith.cmpi ne, %8, %9 : vector<1x256xi32>
    %c0_i32_5 = arith.constant 0 : i32
    %11 = vector.broadcast %c0_i32_5 : i32 to vector<1x256xi32>
    %12 = arith.cmpi slt, %8, %11 : vector<1x256xi32>
    %c0_i32_6 = arith.constant 0 : i32
    %13 = arith.cmpi slt, %6, %c0_i32_6 : i32
    %14 = vector.broadcast %13 : i1 to vector<1x256xi1>
    %15 = vector.broadcast %14 : vector<1x256xi1> to vector<1x256xi1>
    %16 = arith.xori %12, %15 : vector<1x256xi1>
    %17 = arith.andi %16, %10 : vector<1x256xi1>
    %18 = vector.broadcast %6 : i32 to vector<1x256xi32>
    %19 = arith.addi %8, %18 : vector<1x256xi32>
    %20 = arith.select %17, %19, %8 : vector<1x256xi1>, vector<1x256xi32>
    %cst_7 = arith.constant 0.000000e+00 : f32
    %21 = vector.broadcast %cst_7 : f32 to vector<4x17xf32>
    %22 = vector.extract_strided_slice %3 {offsets = [0, 0], sizes = [4, 239], strides = [1, 1]} : vector<4x256xf32> to vector<4x239xf32>
    %23 = tpu.concatenate %21, %22 in 1 : vector<4x17xf32>, vector<4x239xf32> -> vector<4x256xf32>
    %c-1_i32 = arith.constant -1 : i32
    %24 = vector.broadcast %c-1_i32 : i32 to vector<1x256xi32>
    %25 = arith.addi %20, %24 : vector<1x256xi32>
    %c0_i32_8 = arith.constant 0 : i32
    %26 = vector.broadcast %c0_i32_8 : i32 to vector<1x256xi32>
    %27 = arith.cmpi sge, %25, %26 : vector<1x256xi32>
    %c-1_i32_9 = arith.constant -1 : i32
    %28 = vector.broadcast %c-1_i32_9 : i32 to vector<1x256xi32>
    %29 = arith.addi %20, %28 : vector<1x256xi32>
    %c16_i32_10 = arith.constant 16 : i32
    %30 = vector.broadcast %c16_i32_10 : i32 to vector<1x256xi32>
    %31 = arith.cmpi slt, %29, %30 : vector<1x256xi32>
    %32 = arith.andi %27, %31 : vector<1x256xi1>
    %cst_11 = arith.constant 0.000000e+00 : f32
    %33 = vector.shape_cast %32 : vector<1x256xi1> to vector<1x256xi1>
    %34 = vector.broadcast %33 : vector<1x256xi1> to vector<4x256xi1>
    %35 = vector.broadcast %cst_11 : f32 to vector<4x256xf32>
    %36 = arith.select %34, %23, %35 : vector<4x256xi1>, vector<4x256xf32>
    %cst_12 = arith.constant 0.000000e+00 : f32
    %37 = vector.broadcast %cst_12 : f32 to vector<4x16xf32>
    %38 = vector.extract_strided_slice %3 {offsets = [0, 0], sizes = [4, 240], strides = [1, 1]} : vector<4x256xf32> to vector<4x240xf32>
    %39 = tpu.concatenate %37, %38 in 1 : vector<4x16xf32>, vector<4x240xf32> -> vector<4x256xf32>
    %cst_13 = arith.constant 0.000000e+00 : f32
    %40 = vector.broadcast %cst_13 : f32 to vector<4x15xf32>
    %41 = vector.extract_strided_slice %3 {offsets = [0, 0], sizes = [4, 241], strides = [1, 1]} : vector<4x256xf32> to vector<4x241xf32>
    %42 = tpu.concatenate %40, %41 in 1 : vector<4x15xf32>, vector<4x241xf32> -> vector<4x256xf32>
    %c1_i32_14 = arith.constant 1 : i32
    %43 = vector.broadcast %c1_i32_14 : i32 to vector<1x256xi32>
    %44 = arith.addi %20, %43 : vector<1x256xi32>
    %c0_i32_15 = arith.constant 0 : i32
    %45 = vector.broadcast %c0_i32_15 : i32 to vector<1x256xi32>
    %46 = arith.cmpi sge, %44, %45 : vector<1x256xi32>
    %c1_i32_16 = arith.constant 1 : i32
    %47 = vector.broadcast %c1_i32_16 : i32 to vector<1x256xi32>
    %48 = arith.addi %20, %47 : vector<1x256xi32>
    %c16_i32_17 = arith.constant 16 : i32
    %49 = vector.broadcast %c16_i32_17 : i32 to vector<1x256xi32>
    %50 = arith.cmpi slt, %48, %49 : vector<1x256xi32>
    %51 = arith.andi %46, %50 : vector<1x256xi1>
    %cst_18 = arith.constant 0.000000e+00 : f32
    %52 = vector.shape_cast %51 : vector<1x256xi1> to vector<1x256xi1>
    %53 = vector.broadcast %52 : vector<1x256xi1> to vector<4x256xi1>
    %54 = vector.broadcast %cst_18 : f32 to vector<4x256xf32>
    %55 = arith.select %53, %42, %54 : vector<4x256xi1>, vector<4x256xf32>
    %cst_19 = arith.constant 0.000000e+00 : f32
    %56 = vector.broadcast %cst_19 : f32 to vector<4x1xf32>
    %57 = vector.extract_strided_slice %3 {offsets = [0, 0], sizes = [4, 255], strides = [1, 1]} : vector<4x256xf32> to vector<4x255xf32>
    %58 = tpu.concatenate %56, %57 in 1 : vector<4x1xf32>, vector<4x255xf32> -> vector<4x256xf32>
    %cst_20 = arith.constant 0.000000e+00 : f32
    %59 = vector.shape_cast %32 : vector<1x256xi1> to vector<1x256xi1>
    %60 = vector.broadcast %59 : vector<1x256xi1> to vector<4x256xi1>
    %61 = vector.broadcast %cst_20 : f32 to vector<4x256xf32>
    %62 = arith.select %60, %58, %61 : vector<4x256xi1>, vector<4x256xf32>
    %63 = vector.extract_strided_slice %3 {offsets = [0, 1], sizes = [4, 255], strides = [1, 1]} : vector<4x256xf32> to vector<4x255xf32>
    %cst_21 = arith.constant 0.000000e+00 : f32
    %64 = vector.broadcast %cst_21 : f32 to vector<4x1xf32>
    %65 = tpu.concatenate %63, %64 in 1 : vector<4x255xf32>, vector<4x1xf32> -> vector<4x256xf32>
    %cst_22 = arith.constant 0.000000e+00 : f32
    %66 = vector.shape_cast %51 : vector<1x256xi1> to vector<1x256xi1>
    %67 = vector.broadcast %66 : vector<1x256xi1> to vector<4x256xi1>
    %68 = vector.broadcast %cst_22 : f32 to vector<4x256xf32>
    %69 = arith.select %67, %65, %68 : vector<4x256xi1>, vector<4x256xf32>
    %70 = vector.extract_strided_slice %3 {offsets = [0, 15], sizes = [4, 241], strides = [1, 1]} : vector<4x256xf32> to vector<4x241xf32>
    %cst_23 = arith.constant 0.000000e+00 : f32
    %71 = vector.broadcast %cst_23 : f32 to vector<4x15xf32>
    %72 = tpu.concatenate %70, %71 in 1 : vector<4x241xf32>, vector<4x15xf32> -> vector<4x256xf32>
    %cst_24 = arith.constant 0.000000e+00 : f32
    %73 = vector.shape_cast %32 : vector<1x256xi1> to vector<1x256xi1>
    %74 = vector.broadcast %73 : vector<1x256xi1> to vector<4x256xi1>
    %75 = vector.broadcast %cst_24 : f32 to vector<4x256xf32>
    %76 = arith.select %74, %72, %75 : vector<4x256xi1>, vector<4x256xf32>
    %77 = vector.extract_strided_slice %3 {offsets = [0, 16], sizes = [4, 240], strides = [1, 1]} : vector<4x256xf32> to vector<4x240xf32>
    %cst_25 = arith.constant 0.000000e+00 : f32
    %78 = vector.broadcast %cst_25 : f32 to vector<4x16xf32>
    %79 = tpu.concatenate %77, %78 in 1 : vector<4x240xf32>, vector<4x16xf32> -> vector<4x256xf32>
    %80 = vector.extract_strided_slice %3 {offsets = [0, 17], sizes = [4, 239], strides = [1, 1]} : vector<4x256xf32> to vector<4x239xf32>
    %cst_26 = arith.constant 0.000000e+00 : f32
    %81 = vector.broadcast %cst_26 : f32 to vector<4x17xf32>
    %82 = tpu.concatenate %80, %81 in 1 : vector<4x239xf32>, vector<4x17xf32> -> vector<4x256xf32>
    %cst_27 = arith.constant 0.000000e+00 : f32
    %83 = vector.shape_cast %51 : vector<1x256xi1> to vector<1x256xi1>
    %84 = vector.broadcast %83 : vector<1x256xi1> to vector<4x256xi1>
    %85 = vector.broadcast %cst_27 : f32 to vector<4x256xf32>
    %86 = arith.select %84, %82, %85 : vector<4x256xi1>, vector<4x256xf32>
    %87 = tpu.concatenate %36, %39, %55, %62, %3, %69, %76, %79, %86 in 0 : vector<4x256xf32>, vector<4x256xf32>, vector<4x256xf32>, vector<4x256xf32>, vector<4x256xf32>, vector<4x256xf32>, vector<4x256xf32>, vector<4x256xf32>, vector<4x256xf32> -> vector<36x256xf32>
    %c0_28 = arith.constant 0 : index
    %c0_29 = arith.constant 0 : index
    %88 = vector.load %arg3[%c0_28, %c0_29] : memref<4x36xf32, #tpu.memory_space<vmem>>, vector<4x36xf32>
    %cst_30 = arith.constant dense<0.000000e+00> : vector<4x256xf32>
    %89 = tpu.matmul %88, %87, %cst_30 {dimension_numbers = #tpu.dot_dimension_numbers<[1], [0], [0], [1], [0, 0, 1, 1], [], []>} : vector<4x36xf32>, vector<36x256xf32>, vector<4x256xf32> -> vector<4x256xf32>
    %cst_31 = arith.constant 0.000000e+00 : f32
    %90 = vector.broadcast %cst_31 : f32 to vector<4x34xf32>
    %91 = vector.extract_strided_slice %3 {offsets = [0, 0], sizes = [4, 222], strides = [1, 1]} : vector<4x256xf32> to vector<4x222xf32>
    %92 = tpu.concatenate %90, %91 in 1 : vector<4x34xf32>, vector<4x222xf32> -> vector<4x256xf32>
    %c-2_i32 = arith.constant -2 : i32
    %93 = vector.broadcast %c-2_i32 : i32 to vector<1x256xi32>
    %94 = arith.addi %20, %93 : vector<1x256xi32>
    %c0_i32_32 = arith.constant 0 : i32
    %95 = vector.broadcast %c0_i32_32 : i32 to vector<1x256xi32>
    %96 = arith.cmpi sge, %94, %95 : vector<1x256xi32>
    %c-2_i32_33 = arith.constant -2 : i32
    %97 = vector.broadcast %c-2_i32_33 : i32 to vector<1x256xi32>
    %98 = arith.addi %20, %97 : vector<1x256xi32>
    %c16_i32_34 = arith.constant 16 : i32
    %99 = vector.broadcast %c16_i32_34 : i32 to vector<1x256xi32>
    %100 = arith.cmpi slt, %98, %99 : vector<1x256xi32>
    %101 = arith.andi %96, %100 : vector<1x256xi1>
    %cst_35 = arith.constant 0.000000e+00 : f32
    %102 = vector.shape_cast %101 : vector<1x256xi1> to vector<1x256xi1>
    %103 = vector.broadcast %102 : vector<1x256xi1> to vector<4x256xi1>
    %104 = vector.broadcast %cst_35 : f32 to vector<4x256xf32>
    %105 = arith.select %103, %92, %104 : vector<4x256xi1>, vector<4x256xf32>
    %cst_36 = arith.constant 0.000000e+00 : f32
    %106 = vector.broadcast %cst_36 : f32 to vector<4x32xf32>
    %107 = vector.extract_strided_slice %3 {offsets = [0, 0], sizes = [4, 224], strides = [1, 1]} : vector<4x256xf32> to vector<4x224xf32>
    %108 = tpu.concatenate %106, %107 in 1 : vector<4x32xf32>, vector<4x224xf32> -> vector<4x256xf32>
    %cst_37 = arith.constant 0.000000e+00 : f32
    %109 = vector.broadcast %cst_37 : f32 to vector<4x30xf32>
    %110 = vector.extract_strided_slice %3 {offsets = [0, 0], sizes = [4, 226], strides = [1, 1]} : vector<4x256xf32> to vector<4x226xf32>
    %111 = tpu.concatenate %109, %110 in 1 : vector<4x30xf32>, vector<4x226xf32> -> vector<4x256xf32>
    %c2_i32 = arith.constant 2 : i32
    %112 = vector.broadcast %c2_i32 : i32 to vector<1x256xi32>
    %113 = arith.addi %20, %112 : vector<1x256xi32>
    %c0_i32_38 = arith.constant 0 : i32
    %114 = vector.broadcast %c0_i32_38 : i32 to vector<1x256xi32>
    %115 = arith.cmpi sge, %113, %114 : vector<1x256xi32>
    %c2_i32_39 = arith.constant 2 : i32
    %116 = vector.broadcast %c2_i32_39 : i32 to vector<1x256xi32>
    %117 = arith.addi %20, %116 : vector<1x256xi32>
    %c16_i32_40 = arith.constant 16 : i32
    %118 = vector.broadcast %c16_i32_40 : i32 to vector<1x256xi32>
    %119 = arith.cmpi slt, %117, %118 : vector<1x256xi32>
    %120 = arith.andi %115, %119 : vector<1x256xi1>
    %cst_41 = arith.constant 0.000000e+00 : f32
    %121 = vector.shape_cast %120 : vector<1x256xi1> to vector<1x256xi1>
    %122 = vector.broadcast %121 : vector<1x256xi1> to vector<4x256xi1>
    %123 = vector.broadcast %cst_41 : f32 to vector<4x256xf32>
    %124 = arith.select %122, %111, %123 : vector<4x256xi1>, vector<4x256xf32>
    %cst_42 = arith.constant 0.000000e+00 : f32
    %125 = vector.broadcast %cst_42 : f32 to vector<4x2xf32>
    %126 = vector.extract_strided_slice %3 {offsets = [0, 0], sizes = [4, 254], strides = [1, 1]} : vector<4x256xf32> to vector<4x254xf32>
    %127 = tpu.concatenate %125, %126 in 1 : vector<4x2xf32>, vector<4x254xf32> -> vector<4x256xf32>
    %cst_43 = arith.constant 0.000000e+00 : f32
    %128 = vector.shape_cast %101 : vector<1x256xi1> to vector<1x256xi1>
    %129 = vector.broadcast %128 : vector<1x256xi1> to vector<4x256xi1>
    %130 = vector.broadcast %cst_43 : f32 to vector<4x256xf32>
    %131 = arith.select %129, %127, %130 : vector<4x256xi1>, vector<4x256xf32>
    %132 = vector.extract_strided_slice %3 {offsets = [0, 2], sizes = [4, 254], strides = [1, 1]} : vector<4x256xf32> to vector<4x254xf32>
    %cst_44 = arith.constant 0.000000e+00 : f32
    %133 = vector.broadcast %cst_44 : f32 to vector<4x2xf32>
    %134 = tpu.concatenate %132, %133 in 1 : vector<4x254xf32>, vector<4x2xf32> -> vector<4x256xf32>
    %cst_45 = arith.constant 0.000000e+00 : f32
    %135 = vector.shape_cast %120 : vector<1x256xi1> to vector<1x256xi1>
    %136 = vector.broadcast %135 : vector<1x256xi1> to vector<4x256xi1>
    %137 = vector.broadcast %cst_45 : f32 to vector<4x256xf32>
    %138 = arith.select %136, %134, %137 : vector<4x256xi1>, vector<4x256xf32>
    %139 = vector.extract_strided_slice %3 {offsets = [0, 30], sizes = [4, 226], strides = [1, 1]} : vector<4x256xf32> to vector<4x226xf32>
    %cst_46 = arith.constant 0.000000e+00 : f32
    %140 = vector.broadcast %cst_46 : f32 to vector<4x30xf32>
    %141 = tpu.concatenate %139, %140 in 1 : vector<4x226xf32>, vector<4x30xf32> -> vector<4x256xf32>
    %cst_47 = arith.constant 0.000000e+00 : f32
    %142 = vector.shape_cast %101 : vector<1x256xi1> to vector<1x256xi1>
    %143 = vector.broadcast %142 : vector<1x256xi1> to vector<4x256xi1>
    %144 = vector.broadcast %cst_47 : f32 to vector<4x256xf32>
    %145 = arith.select %143, %141, %144 : vector<4x256xi1>, vector<4x256xf32>
    %146 = vector.extract_strided_slice %3 {offsets = [0, 32], sizes = [4, 224], strides = [1, 1]} : vector<4x256xf32> to vector<4x224xf32>
    %cst_48 = arith.constant 0.000000e+00 : f32
    %147 = vector.broadcast %cst_48 : f32 to vector<4x32xf32>
    %148 = tpu.concatenate %146, %147 in 1 : vector<4x224xf32>, vector<4x32xf32> -> vector<4x256xf32>
    %149 = vector.extract_strided_slice %3 {offsets = [0, 34], sizes = [4, 222], strides = [1, 1]} : vector<4x256xf32> to vector<4x222xf32>
    %cst_49 = arith.constant 0.000000e+00 : f32
    %150 = vector.broadcast %cst_49 : f32 to vector<4x34xf32>
    %151 = tpu.concatenate %149, %150 in 1 : vector<4x222xf32>, vector<4x34xf32> -> vector<4x256xf32>
    %cst_50 = arith.constant 0.000000e+00 : f32
    %152 = vector.shape_cast %120 : vector<1x256xi1> to vector<1x256xi1>
    %153 = vector.broadcast %152 : vector<1x256xi1> to vector<4x256xi1>
    %154 = vector.broadcast %cst_50 : f32 to vector<4x256xf32>
    %155 = arith.select %153, %151, %154 : vector<4x256xi1>, vector<4x256xf32>
    %156 = tpu.concatenate %105, %108, %124, %131, %3, %138, %145, %148, %155 in 0 : vector<4x256xf32>, vector<4x256xf32>, vector<4x256xf32>, vector<4x256xf32>, vector<4x256xf32>, vector<4x256xf32>, vector<4x256xf32>, vector<4x256xf32>, vector<4x256xf32> -> vector<36x256xf32>
    %c0_51 = arith.constant 0 : index
    %c0_52 = arith.constant 0 : index
    %157 = vector.load %arg4[%c0_51, %c0_52] : memref<4x36xf32, #tpu.memory_space<vmem>>, vector<4x36xf32>
    %cst_53 = arith.constant dense<0.000000e+00> : vector<4x256xf32>
    %158 = tpu.matmul %157, %156, %cst_53 {dimension_numbers = #tpu.dot_dimension_numbers<[1], [0], [0], [1], [0, 0, 1, 1], [], []>} : vector<4x36xf32>, vector<36x256xf32>, vector<4x256xf32> -> vector<4x256xf32>
    %cst_54 = arith.constant 0.000000e+00 : f32
    %159 = vector.broadcast %cst_54 : f32 to vector<4x68xf32>
    %160 = vector.extract_strided_slice %3 {offsets = [0, 0], sizes = [4, 188], strides = [1, 1]} : vector<4x256xf32> to vector<4x188xf32>
    %161 = tpu.concatenate %159, %160 in 1 : vector<4x68xf32>, vector<4x188xf32> -> vector<4x256xf32>
    %c-4_i32 = arith.constant -4 : i32
    %162 = vector.broadcast %c-4_i32 : i32 to vector<1x256xi32>
    %163 = arith.addi %20, %162 : vector<1x256xi32>
    %c0_i32_55 = arith.constant 0 : i32
    %164 = vector.broadcast %c0_i32_55 : i32 to vector<1x256xi32>
    %165 = arith.cmpi sge, %163, %164 : vector<1x256xi32>
    %c-4_i32_56 = arith.constant -4 : i32
    %166 = vector.broadcast %c-4_i32_56 : i32 to vector<1x256xi32>
    %167 = arith.addi %20, %166 : vector<1x256xi32>
    %c16_i32_57 = arith.constant 16 : i32
    %168 = vector.broadcast %c16_i32_57 : i32 to vector<1x256xi32>
    %169 = arith.cmpi slt, %167, %168 : vector<1x256xi32>
    %170 = arith.andi %165, %169 : vector<1x256xi1>
    %cst_58 = arith.constant 0.000000e+00 : f32
    %171 = vector.shape_cast %170 : vector<1x256xi1> to vector<1x256xi1>
    %172 = vector.broadcast %171 : vector<1x256xi1> to vector<4x256xi1>
    %173 = vector.broadcast %cst_58 : f32 to vector<4x256xf32>
    %174 = arith.select %172, %161, %173 : vector<4x256xi1>, vector<4x256xf32>
    %cst_59 = arith.constant 0.000000e+00 : f32
    %175 = vector.broadcast %cst_59 : f32 to vector<4x64xf32>
    %176 = vector.extract_strided_slice %3 {offsets = [0, 0], sizes = [4, 192], strides = [1, 1]} : vector<4x256xf32> to vector<4x192xf32>
    %177 = tpu.concatenate %175, %176 in 1 : vector<4x64xf32>, vector<4x192xf32> -> vector<4x256xf32>
    %cst_60 = arith.constant 0.000000e+00 : f32
    %178 = vector.broadcast %cst_60 : f32 to vector<4x60xf32>
    %179 = vector.extract_strided_slice %3 {offsets = [0, 0], sizes = [4, 196], strides = [1, 1]} : vector<4x256xf32> to vector<4x196xf32>
    %180 = tpu.concatenate %178, %179 in 1 : vector<4x60xf32>, vector<4x196xf32> -> vector<4x256xf32>
    %c4_i32 = arith.constant 4 : i32
    %181 = vector.broadcast %c4_i32 : i32 to vector<1x256xi32>
    %182 = arith.addi %20, %181 : vector<1x256xi32>
    %c0_i32_61 = arith.constant 0 : i32
    %183 = vector.broadcast %c0_i32_61 : i32 to vector<1x256xi32>
    %184 = arith.cmpi sge, %182, %183 : vector<1x256xi32>
    %c4_i32_62 = arith.constant 4 : i32
    %185 = vector.broadcast %c4_i32_62 : i32 to vector<1x256xi32>
    %186 = arith.addi %20, %185 : vector<1x256xi32>
    %c16_i32_63 = arith.constant 16 : i32
    %187 = vector.broadcast %c16_i32_63 : i32 to vector<1x256xi32>
    %188 = arith.cmpi slt, %186, %187 : vector<1x256xi32>
    %189 = arith.andi %184, %188 : vector<1x256xi1>
    %cst_64 = arith.constant 0.000000e+00 : f32
    %190 = vector.shape_cast %189 : vector<1x256xi1> to vector<1x256xi1>
    %191 = vector.broadcast %190 : vector<1x256xi1> to vector<4x256xi1>
    %192 = vector.broadcast %cst_64 : f32 to vector<4x256xf32>
    %193 = arith.select %191, %180, %192 : vector<4x256xi1>, vector<4x256xf32>
    %cst_65 = arith.constant 0.000000e+00 : f32
    %194 = vector.broadcast %cst_65 : f32 to vector<4x4xf32>
    %195 = vector.extract_strided_slice %3 {offsets = [0, 0], sizes = [4, 252], strides = [1, 1]} : vector<4x256xf32> to vector<4x252xf32>
    %196 = tpu.concatenate %194, %195 in 1 : vector<4x4xf32>, vector<4x252xf32> -> vector<4x256xf32>
    %cst_66 = arith.constant 0.000000e+00 : f32
    %197 = vector.shape_cast %170 : vector<1x256xi1> to vector<1x256xi1>
    %198 = vector.broadcast %197 : vector<1x256xi1> to vector<4x256xi1>
    %199 = vector.broadcast %cst_66 : f32 to vector<4x256xf32>
    %200 = arith.select %198, %196, %199 : vector<4x256xi1>, vector<4x256xf32>
    %201 = vector.extract_strided_slice %3 {offsets = [0, 4], sizes = [4, 252], strides = [1, 1]} : vector<4x256xf32> to vector<4x252xf32>
    %cst_67 = arith.constant 0.000000e+00 : f32
    %202 = vector.broadcast %cst_67 : f32 to vector<4x4xf32>
    %203 = tpu.concatenate %201, %202 in 1 : vector<4x252xf32>, vector<4x4xf32> -> vector<4x256xf32>
    %cst_68 = arith.constant 0.000000e+00 : f32
    %204 = vector.shape_cast %189 : vector<1x256xi1> to vector<1x256xi1>
    %205 = vector.broadcast %204 : vector<1x256xi1> to vector<4x256xi1>
    %206 = vector.broadcast %cst_68 : f32 to vector<4x256xf32>
    %207 = arith.select %205, %203, %206 : vector<4x256xi1>, vector<4x256xf32>
    %208 = vector.extract_strided_slice %3 {offsets = [0, 60], sizes = [4, 196], strides = [1, 1]} : vector<4x256xf32> to vector<4x196xf32>
    %cst_69 = arith.constant 0.000000e+00 : f32
    %209 = vector.broadcast %cst_69 : f32 to vector<4x60xf32>
    %210 = tpu.concatenate %208, %209 in 1 : vector<4x196xf32>, vector<4x60xf32> -> vector<4x256xf32>
    %cst_70 = arith.constant 0.000000e+00 : f32
    %211 = vector.shape_cast %170 : vector<1x256xi1> to vector<1x256xi1>
    %212 = vector.broadcast %211 : vector<1x256xi1> to vector<4x256xi1>
    %213 = vector.broadcast %cst_70 : f32 to vector<4x256xf32>
    %214 = arith.select %212, %210, %213 : vector<4x256xi1>, vector<4x256xf32>
    %215 = vector.extract_strided_slice %3 {offsets = [0, 64], sizes = [4, 192], strides = [1, 1]} : vector<4x256xf32> to vector<4x192xf32>
    %cst_71 = arith.constant 0.000000e+00 : f32
    %216 = vector.broadcast %cst_71 : f32 to vector<4x64xf32>
    %217 = tpu.concatenate %215, %216 in 1 : vector<4x192xf32>, vector<4x64xf32> -> vector<4x256xf32>
    %218 = vector.extract_strided_slice %3 {offsets = [0, 68], sizes = [4, 188], strides = [1, 1]} : vector<4x256xf32> to vector<4x188xf32>
    %cst_72 = arith.constant 0.000000e+00 : f32
    %219 = vector.broadcast %cst_72 : f32 to vector<4x68xf32>
    %220 = tpu.concatenate %218, %219 in 1 : vector<4x188xf32>, vector<4x68xf32> -> vector<4x256xf32>
    %cst_73 = arith.constant 0.000000e+00 : f32
    %221 = vector.shape_cast %189 : vector<1x256xi1> to vector<1x256xi1>
    %222 = vector.broadcast %221 : vector<1x256xi1> to vector<4x256xi1>
    %223 = vector.broadcast %cst_73 : f32 to vector<4x256xf32>
    %224 = arith.select %222, %220, %223 : vector<4x256xi1>, vector<4x256xf32>
    %225 = tpu.concatenate %174, %177, %193, %200, %3, %207, %214, %217, %224 in 0 : vector<4x256xf32>, vector<4x256xf32>, vector<4x256xf32>, vector<4x256xf32>, vector<4x256xf32>, vector<4x256xf32>, vector<4x256xf32>, vector<4x256xf32>, vector<4x256xf32> -> vector<36x256xf32>
    %c0_74 = arith.constant 0 : index
    %c0_75 = arith.constant 0 : index
    %226 = vector.load %arg5[%c0_74, %c0_75] : memref<4x36xf32, #tpu.memory_space<vmem>>, vector<4x36xf32>
    %cst_76 = arith.constant dense<0.000000e+00> : vector<4x256xf32>
    %227 = tpu.matmul %226, %225, %cst_76 {dimension_numbers = #tpu.dot_dimension_numbers<[1], [0], [0], [1], [0, 0, 1, 1], [], []>} : vector<4x36xf32>, vector<36x256xf32>, vector<4x256xf32> -> vector<4x256xf32>
    %cst_77 = arith.constant 0.000000e+00 : f32
    %228 = vector.broadcast %cst_77 : f32 to vector<4x136xf32>
    %229 = vector.extract_strided_slice %3 {offsets = [0, 0], sizes = [4, 120], strides = [1, 1]} : vector<4x256xf32> to vector<4x120xf32>
    %230 = tpu.concatenate %228, %229 in 1 : vector<4x136xf32>, vector<4x120xf32> -> vector<4x256xf32>
    %c-8_i32 = arith.constant -8 : i32
    %231 = vector.broadcast %c-8_i32 : i32 to vector<1x256xi32>
    %232 = arith.addi %20, %231 : vector<1x256xi32>
    %c0_i32_78 = arith.constant 0 : i32
    %233 = vector.broadcast %c0_i32_78 : i32 to vector<1x256xi32>
    %234 = arith.cmpi sge, %232, %233 : vector<1x256xi32>
    %c-8_i32_79 = arith.constant -8 : i32
    %235 = vector.broadcast %c-8_i32_79 : i32 to vector<1x256xi32>
    %236 = arith.addi %20, %235 : vector<1x256xi32>
    %c16_i32_80 = arith.constant 16 : i32
    %237 = vector.broadcast %c16_i32_80 : i32 to vector<1x256xi32>
    %238 = arith.cmpi slt, %236, %237 : vector<1x256xi32>
    %239 = arith.andi %234, %238 : vector<1x256xi1>
    %cst_81 = arith.constant 0.000000e+00 : f32
    %240 = vector.shape_cast %239 : vector<1x256xi1> to vector<1x256xi1>
    %241 = vector.broadcast %240 : vector<1x256xi1> to vector<4x256xi1>
    %242 = vector.broadcast %cst_81 : f32 to vector<4x256xf32>
    %243 = arith.select %241, %230, %242 : vector<4x256xi1>, vector<4x256xf32>
    %cst_82 = arith.constant 0.000000e+00 : f32
    %244 = vector.broadcast %cst_82 : f32 to vector<4x128xf32>
    %245 = vector.extract_strided_slice %3 {offsets = [0, 0], sizes = [4, 128], strides = [1, 1]} : vector<4x256xf32> to vector<4x128xf32>
    %246 = tpu.concatenate %244, %245 in 1 : vector<4x128xf32>, vector<4x128xf32> -> vector<4x256xf32>
    %cst_83 = arith.constant 0.000000e+00 : f32
    %247 = vector.broadcast %cst_83 : f32 to vector<4x120xf32>
    %248 = vector.extract_strided_slice %3 {offsets = [0, 0], sizes = [4, 136], strides = [1, 1]} : vector<4x256xf32> to vector<4x136xf32>
    %249 = tpu.concatenate %247, %248 in 1 : vector<4x120xf32>, vector<4x136xf32> -> vector<4x256xf32>
    %c8_i32 = arith.constant 8 : i32
    %250 = vector.broadcast %c8_i32 : i32 to vector<1x256xi32>
    %251 = arith.addi %20, %250 : vector<1x256xi32>
    %c0_i32_84 = arith.constant 0 : i32
    %252 = vector.broadcast %c0_i32_84 : i32 to vector<1x256xi32>
    %253 = arith.cmpi sge, %251, %252 : vector<1x256xi32>
    %c8_i32_85 = arith.constant 8 : i32
    %254 = vector.broadcast %c8_i32_85 : i32 to vector<1x256xi32>
    %255 = arith.addi %20, %254 : vector<1x256xi32>
    %c16_i32_86 = arith.constant 16 : i32
    %256 = vector.broadcast %c16_i32_86 : i32 to vector<1x256xi32>
    %257 = arith.cmpi slt, %255, %256 : vector<1x256xi32>
    %258 = arith.andi %253, %257 : vector<1x256xi1>
    %cst_87 = arith.constant 0.000000e+00 : f32
    %259 = vector.shape_cast %258 : vector<1x256xi1> to vector<1x256xi1>
    %260 = vector.broadcast %259 : vector<1x256xi1> to vector<4x256xi1>
    %261 = vector.broadcast %cst_87 : f32 to vector<4x256xf32>
    %262 = arith.select %260, %249, %261 : vector<4x256xi1>, vector<4x256xf32>
    %cst_88 = arith.constant 0.000000e+00 : f32
    %263 = vector.broadcast %cst_88 : f32 to vector<4x8xf32>
    %264 = vector.extract_strided_slice %3 {offsets = [0, 0], sizes = [4, 248], strides = [1, 1]} : vector<4x256xf32> to vector<4x248xf32>
    %265 = tpu.concatenate %263, %264 in 1 : vector<4x8xf32>, vector<4x248xf32> -> vector<4x256xf32>
    %cst_89 = arith.constant 0.000000e+00 : f32
    %266 = vector.shape_cast %239 : vector<1x256xi1> to vector<1x256xi1>
    %267 = vector.broadcast %266 : vector<1x256xi1> to vector<4x256xi1>
    %268 = vector.broadcast %cst_89 : f32 to vector<4x256xf32>
    %269 = arith.select %267, %265, %268 : vector<4x256xi1>, vector<4x256xf32>
    %270 = vector.extract_strided_slice %3 {offsets = [0, 8], sizes = [4, 248], strides = [1, 1]} : vector<4x256xf32> to vector<4x248xf32>
    %cst_90 = arith.constant 0.000000e+00 : f32
    %271 = vector.broadcast %cst_90 : f32 to vector<4x8xf32>
    %272 = tpu.concatenate %270, %271 in 1 : vector<4x248xf32>, vector<4x8xf32> -> vector<4x256xf32>
    %cst_91 = arith.constant 0.000000e+00 : f32
    %273 = vector.shape_cast %258 : vector<1x256xi1> to vector<1x256xi1>
    %274 = vector.broadcast %273 : vector<1x256xi1> to vector<4x256xi1>
    %275 = vector.broadcast %cst_91 : f32 to vector<4x256xf32>
    %276 = arith.select %274, %272, %275 : vector<4x256xi1>, vector<4x256xf32>
    %277 = vector.extract_strided_slice %3 {offsets = [0, 120], sizes = [4, 136], strides = [1, 1]} : vector<4x256xf32> to vector<4x136xf32>
    %cst_92 = arith.constant 0.000000e+00 : f32
    %278 = vector.broadcast %cst_92 : f32 to vector<4x120xf32>
    %279 = tpu.concatenate %277, %278 in 1 : vector<4x136xf32>, vector<4x120xf32> -> vector<4x256xf32>
    %cst_93 = arith.constant 0.000000e+00 : f32
    %280 = vector.shape_cast %239 : vector<1x256xi1> to vector<1x256xi1>
    %281 = vector.broadcast %280 : vector<1x256xi1> to vector<4x256xi1>
    %282 = vector.broadcast %cst_93 : f32 to vector<4x256xf32>
    %283 = arith.select %281, %279, %282 : vector<4x256xi1>, vector<4x256xf32>
    %284 = vector.extract_strided_slice %3 {offsets = [0, 128], sizes = [4, 128], strides = [1, 1]} : vector<4x256xf32> to vector<4x128xf32>
    %cst_94 = arith.constant 0.000000e+00 : f32
    %285 = vector.broadcast %cst_94 : f32 to vector<4x128xf32>
    %286 = tpu.concatenate %284, %285 in 1 : vector<4x128xf32>, vector<4x128xf32> -> vector<4x256xf32>
    %287 = vector.extract_strided_slice %3 {offsets = [0, 136], sizes = [4, 120], strides = [1, 1]} : vector<4x256xf32> to vector<4x120xf32>
    %cst_95 = arith.constant 0.000000e+00 : f32
    %288 = vector.broadcast %cst_95 : f32 to vector<4x136xf32>
    %289 = tpu.concatenate %287, %288 in 1 : vector<4x120xf32>, vector<4x136xf32> -> vector<4x256xf32>
    %cst_96 = arith.constant 0.000000e+00 : f32
    %290 = vector.shape_cast %258 : vector<1x256xi1> to vector<1x256xi1>
    %291 = vector.broadcast %290 : vector<1x256xi1> to vector<4x256xi1>
    %292 = vector.broadcast %cst_96 : f32 to vector<4x256xf32>
    %293 = arith.select %291, %289, %292 : vector<4x256xi1>, vector<4x256xf32>
    %294 = tpu.concatenate %243, %246, %262, %269, %3, %276, %283, %286, %293 in 0 : vector<4x256xf32>, vector<4x256xf32>, vector<4x256xf32>, vector<4x256xf32>, vector<4x256xf32>, vector<4x256xf32>, vector<4x256xf32>, vector<4x256xf32>, vector<4x256xf32> -> vector<36x256xf32>
    %c0_97 = arith.constant 0 : index
    %c0_98 = arith.constant 0 : index
    %295 = vector.load %arg6[%c0_97, %c0_98] : memref<4x36xf32, #tpu.memory_space<vmem>>, vector<4x36xf32>
    %cst_99 = arith.constant dense<0.000000e+00> : vector<4x256xf32>
    %296 = tpu.matmul %295, %294, %cst_99 {dimension_numbers = #tpu.dot_dimension_numbers<[1], [0], [0], [1], [0, 0, 1, 1], [], []>} : vector<4x36xf32>, vector<36x256xf32>, vector<4x256xf32> -> vector<4x256xf32>
    %c0_100 = arith.constant 0 : index
    %c0_101 = arith.constant 0 : index
    %297 = vector.load %arg7[%c0_100, %c0_101] : memref<4x4xf32, #tpu.memory_space<vmem>>, vector<4x4xf32>
    %cst_102 = arith.constant dense<0.000000e+00> : vector<4x256xf32>
    %298 = tpu.matmul %297, %3, %cst_102 {dimension_numbers = #tpu.dot_dimension_numbers<[1], [0], [0], [1], [0, 0, 1, 1], [], []>} : vector<4x4xf32>, vector<4x256xf32>, vector<4x256xf32> -> vector<4x256xf32>
    %299 = arith.addf %158, %227 : vector<4x256xf32>
    %300 = arith.addf %299, %296 : vector<4x256xf32>
    %301 = arith.addf %300, %298 : vector<4x256xf32>
    %302 = tpu.concatenate %89, %158, %299, %300, %301 in 0 : vector<4x256xf32>, vector<4x256xf32>, vector<4x256xf32>, vector<4x256xf32>, vector<4x256xf32> -> vector<20x256xf32>
    %cst_103 = arith.constant dense<0.000000e+00> : vector<20xf32>
    %303 = vector.multi_reduction <add>, %302, %cst_103 [1] : vector<20x256xf32> to vector<20xf32>
    %304 = vector.shape_cast %303 : vector<20xf32> to vector<20x1xf32>
    %cst_104 = arith.constant 2.560000e+02 : f32
    %305 = vector.broadcast %cst_104 : f32 to vector<20x1xf32>
    %306 = arith.divf %304, %305 : vector<20x1xf32>
    %cst_105 = arith.constant 0.000000e+00 : f32
    %307 = vector.broadcast %cst_105 : f32 to vector<1x1xf32>
    %308 = tpu.concatenate %307, %306, %307 in 0 : vector<1x1xf32>, vector<20x1xf32>, vector<1x1xf32> -> vector<22x1xf32>
    %c0_106 = arith.constant 0 : index
    %309 = memref.load %arg13[%c0_106] : memref<3xf32, #tpu.memory_space<smem>>
    %310 = vector.extract_strided_slice %308 {offsets = [0, 0], sizes = [20, 1], strides = [1, 1]} : vector<22x1xf32> to vector<20x1xf32>
    %311 = vector.broadcast %309 : f32 to vector<20x1xf32>
    %312 = arith.mulf %311, %310 : vector<20x1xf32>
    %c1 = arith.constant 1 : index
    %313 = memref.load %arg13[%c1] : memref<3xf32, #tpu.memory_space<smem>>
    %314 = vector.extract_strided_slice %308 {offsets = [1, 0], sizes = [20, 1], strides = [1, 1]} : vector<22x1xf32> to vector<20x1xf32>
    %315 = vector.broadcast %313 : f32 to vector<20x1xf32>
    %316 = arith.mulf %315, %314 : vector<20x1xf32>
    %317 = arith.addf %312, %316 : vector<20x1xf32>
    %c2 = arith.constant 2 : index
    %318 = memref.load %arg13[%c2] : memref<3xf32, #tpu.memory_space<smem>>
    %319 = vector.extract_strided_slice %308 {offsets = [2, 0], sizes = [20, 1], strides = [1, 1]} : vector<22x1xf32> to vector<20x1xf32>
    %320 = vector.broadcast %318 : f32 to vector<20x1xf32>
    %321 = arith.mulf %320, %319 : vector<20x1xf32>
    %322 = arith.addf %317, %321 : vector<20x1xf32>
    %c0_107 = arith.constant 0 : index
    %323 = memref.load %arg14[%c0_107] : memref<1xf32, #tpu.memory_space<smem>>
    %324 = vector.broadcast %323 : f32 to vector<20x1xf32>
    %325 = arith.addf %322, %324 : vector<20x1xf32>
    %326 = arith.negf %325 : vector<20x1xf32>
    %327 = math.exp %326 : vector<20x1xf32>
    %cst_108 = arith.constant 1.000000e+00 : f32
    %328 = vector.broadcast %cst_108 : f32 to vector<20x1xf32>
    %329 = arith.addf %328, %327 : vector<20x1xf32>
    %330 = arith.divf %328, %329 : vector<20x1xf32>
    %331 = vector.broadcast %330 : vector<20x1xf32> to vector<20x256xf32>
    %332 = arith.mulf %302, %331 : vector<20x256xf32>
    %c0_109 = arith.constant 0 : index
    %c0_110 = arith.constant 0 : index
    %333 = vector.load %arg9[%c0_109, %c0_110] : memref<20x1xf32, #tpu.memory_space<vmem>>, vector<20x1xf32>
    %c0_111 = arith.constant 0 : index
    %c0_112 = arith.constant 0 : index
    %334 = vector.load %arg8[%c0_111, %c0_112] : memref<20x1xf32, #tpu.memory_space<vmem>>, vector<20x1xf32>
    %335 = vector.broadcast %334 : vector<20x1xf32> to vector<20x256xf32>
    %336 = arith.mulf %335, %332 : vector<20x256xf32>
    %337 = arith.negf %336 : vector<20x256xf32>
    %338 = math.exp %337 : vector<20x256xf32>
    %cst_113 = arith.constant 1.000000e+00 : f32
    %339 = vector.broadcast %cst_113 : f32 to vector<20x256xf32>
    %340 = arith.addf %339, %338 : vector<20x256xf32>
    %341 = arith.divf %339, %340 : vector<20x256xf32>
    %342 = arith.mulf %336, %341 : vector<20x256xf32>
    %343 = vector.broadcast %333 : vector<20x1xf32> to vector<20x256xf32>
    %344 = arith.mulf %343, %342 : vector<20x256xf32>
    %c0_114 = arith.constant 0 : index
    %c0_115 = arith.constant 0 : index
    %345 = vector.load %arg10[%c0_114, %c0_115] : memref<20x1xf32, #tpu.memory_space<vmem>>, vector<20x1xf32>
    %346 = vector.broadcast %345 : vector<20x1xf32> to vector<20x256xf32>
    %347 = arith.addf %344, %346 : vector<20x256xf32>
    %348 = arith.addf %347, %1 : vector<20x256xf32>
    %c0_116 = arith.constant 0 : index
    %c0_117 = arith.constant 0 : index
    %349 = vector.load %arg11[%c0_116, %c0_117] : memref<20x1xf32, #tpu.memory_space<vmem>>, vector<20x1xf32>
    %350 = vector.broadcast %349 : vector<20x1xf32> to vector<20x256xf32>
    %351 = arith.mulf %350, %348 : vector<20x256xf32>
    %c0_118 = arith.constant 0 : index
    %c0_119 = arith.constant 0 : index
    %352 = vector.load %arg12[%c0_118, %c0_119] : memref<20x1xf32, #tpu.memory_space<vmem>>, vector<20x1xf32>
    %353 = vector.broadcast %352 : vector<20x1xf32> to vector<20x256xf32>
    %354 = arith.addf %351, %353 : vector<20x256xf32>
    %355 = arith.negf %354 : vector<20x256xf32>
    %356 = math.exp %355 : vector<20x256xf32>
    %cst_120 = arith.constant 1.000000e+00 : f32
    %357 = vector.broadcast %cst_120 : f32 to vector<20x256xf32>
    %358 = arith.addf %357, %356 : vector<20x256xf32>
    %359 = arith.divf %357, %358 : vector<20x256xf32>
    %360 = arith.mulf %354, %359 : vector<20x256xf32>
    %c0_121 = arith.constant 0 : index
    %c0_122 = arith.constant 0 : index
    %c0_123 = arith.constant 0 : index
    %361 = vector.load %arg15[%c0_121, %c0_122, %c0_123] : memref<1x20x256xf32, #tpu.memory_space<vmem>>, vector<1x20x256xf32>
    %362 = vector.shape_cast %361 : vector<1x20x256xf32> to vector<20x256xf32>
    %363 = vector.shape_cast %360 : vector<20x256xf32> to vector<1x20x256xf32>
    tpu.vector_store %arg15[%c0_121, %c0_122, %c0_123], %363 {strides = array<i32>} : memref<1x20x256xf32, #tpu.memory_space<vmem>>, vector<1x20x256xf32>,
    return
  }
  func.func @transform_0(%arg0: i32) -> (i32, i32, i32) {
    %c0_i32 = arith.constant 0 : i32
    %c0_i32_0 = arith.constant 0 : i32
    %c0_i32_1 = arith.constant 0 : i32
    return %arg0, %c0_i32, %c0_i32_0 : i32, i32, i32
  }
  func.func @transform_1(%arg0: i32) -> (i32, i32) {
    %c0_i32 = arith.constant 0 : i32
    %c0_i32_0 = arith.constant 0 : i32
    %c0_i32_1 = arith.constant 0 : i32
    return %c0_i32, %c0_i32_0 : i32, i32
  }
  func.func @transform_2(%arg0: i32) -> (i32, i32) {
    %c0_i32 = arith.constant 0 : i32
    %c0_i32_0 = arith.constant 0 : i32
    %c0_i32_1 = arith.constant 0 : i32
    return %c0_i32, %c0_i32_0 : i32, i32
  }
  func.func @transform_3(%arg0: i32) -> (i32, i32) {
    %c0_i32 = arith.constant 0 : i32
    %c0_i32_0 = arith.constant 0 : i32
    %c0_i32_1 = arith.constant 0 : i32
    return %c0_i32, %c0_i32_0 : i32, i32
  }
  func.func @transform_4(%arg0: i32) -> (i32, i32) {
    %c0_i32 = arith.constant 0 : i32
    %c0_i32_0 = arith.constant 0 : i32
    %c0_i32_1 = arith.constant 0 : i32
    return %c0_i32, %c0_i32_0 : i32, i32
  }
  func.func @transform_5(%arg0: i32) -> (i32, i32) {
    %c0_i32 = arith.constant 0 : i32
    %c0_i32_0 = arith.constant 0 : i32
    %c0_i32_1 = arith.constant 0 : i32
    return %c0_i32, %c0_i32_0 : i32, i32
  }
  func.func @transform_6(%arg0: i32) -> (i32, i32) {
    %c0_i32 = arith.constant 0 : i32
    %c0_i32_0 = arith.constant 0 : i32
    %c0_i32_1 = arith.constant 0 : i32
    return %c0_i32, %c0_i32_0 : i32, i32
  }
  func.func @transform_7(%arg0: i32) -> (i32, i32) {
    %c0_i32 = arith.constant 0 : i32
    %c0_i32_0 = arith.constant 0 : i32
    %c0_i32_1 = arith.constant 0 : i32
    return %c0_i32, %c0_i32_0 : i32, i32
  }
  func.func @transform_8(%arg0: i32) -> (i32, i32) {
    %c0_i32 = arith.constant 0 : i32
    %c0_i32_0 = arith.constant 0 : i32
    %c0_i32_1 = arith.constant 0 : i32
    return %c0_i32, %c0_i32_0 : i32, i32
  }
  func.func @transform_9(%arg0: i32) -> (i32, i32) {
    %c0_i32 = arith.constant 0 : i32
    %c0_i32_0 = arith.constant 0 : i32
    %c0_i32_1 = arith.constant 0 : i32
    return %c0_i32, %c0_i32_0 : i32, i32
  }
  func.func @transform_10(%arg0: i32) -> (i32, i32) {
    %c0_i32 = arith.constant 0 : i32
    %c0_i32_0 = arith.constant 0 : i32
    %c0_i32_1 = arith.constant 0 : i32
    return %c0_i32, %c0_i32_0 : i32, i32
  }
  func.func @transform_11(%arg0: i32) -> (i32, i32) {
    %c0_i32 = arith.constant 0 : i32
    %c0_i32_0 = arith.constant 0 : i32
    %c0_i32_1 = arith.constant 0 : i32
    return %c0_i32, %c0_i32_0 : i32, i32
  }
  func.func @transform_12(%arg0: i32) -> i32 {
    %c0_i32 = arith.constant 0 : i32
    %c0_i32_0 = arith.constant 0 : i32
    return %c0_i32 : i32
  }
  func.func @transform_13(%arg0: i32) -> i32 {
    %c0_i32 = arith.constant 0 : i32
    %c0_i32_0 = arith.constant 0 : i32
    return %c0_i32 : i32
  }
  func.func @transform_14(%arg0: i32) -> (i32, i32, i32) {
    %c0_i32 = arith.constant 0 : i32
    %c0_i32_0 = arith.constant 0 : i32
    %c0_i32_1 = arith.constant 0 : i32
    return %arg0, %c0_i32, %c0_i32_0 : i32, i32, i32
  }
}

</mosaic_0001>

<bundles_post_ra>
// kernel: tpu_custom_call.1
= control target key start
LH: loop header
LB: loop body
LE: loop exit
PB: predicated region body
PF: predicated region fallthrough
CT: control target
= control target key end

     0   :  { %s2827_s0 = inlined_call_operand.vmem [shape: f32[2,20,256], index: 0, kind: input, shape index: {}]   ;;  %s2828_s1 = inlined_call_operand.vmem [shape: f32[4,20], index: 1, kind: input, shape index: {}]   ;;  %s2829_s2 = inlined_call_operand.vmem [shape: f32[4,36], index: 2, kind: input, shape index: {}]   ;;  %s2830_s3 = inlined_call_operand.vmem [shape: f32[4,36], index: 3, kind: input, shape index: {}]   ;;  %s2831_s4 = inlined_call_operand.vmem [shape: f32[4,36], index: 4, kind: input, shape index: {}]   ;;  %s2832_s5 = inlined_call_operand.vmem [shape: f32[4,36], index: 5, kind: input, shape index: {}]   ;;  %s2833_s6 = inlined_call_operand.vmem [shape: f32[4,4], index: 6, kind: input, shape index: {}]   ;;  %s2834_s7 = inlined_call_operand.vmem [shape: f32[20,1], index: 7, kind: input, shape index: {}]   ;;  %s2835_s8 = inlined_call_operand.vmem [shape: f32[20,1], index: 8, kind: input, shape index: {}]   ;;  %s2836_s9 = inlined_call_operand.vmem [shape: f32[20,1], index: 9, kind: input, shape index: {}]   ;;  %s2837_s10 = inlined_call_operand.vmem [shape: f32[20,1], index: 10, kind: input, shape index: {}]   ;;  %s2838_s11 = inlined_call_operand.vmem [shape: f32[20,1], index: 11, kind: input, shape index: {}]   ;;  %s2839_s12 = inlined_call_operand.vmem [shape: f32[3], index: 12, kind: input, shape index: {}]   ;;  %s2840_s13 = inlined_call_operand.<no memory space> [shape: f32[1], index: 13, kind: input, shape index: {}]   ;;  %s2841_s14 = inlined_call_operand.vmem [shape: f32[2,20,256], index: 14, kind: output, shape index: {}]  }
   0x1   :  { %19 = sst [smem:[#allocation2]] %s2840_s13 }
   0x2   :  { %20 = vsyncpa [#allocation4], 0  ;;  %s2322_s15 = smov 0  }
   0x3 LB: > { %s1897_s16 = sadd.s32 4294967295, %s2215_s15   ;;  %p1899_p0 = scmp.ge.s32.totalorder %s2215_s15, 1  ;;  %s2215_s15 = sphi %s2322_s15, %s26_s15  }
   0x4   : > { %p356_p1 = scmp.lt.s32.totalorder %s2215_s15, 3  ;;  %s402_s19 = sshll.u32 %s2839_s12, 4  ;;  %s403_s19 = int_to_ptr.vmem [resolvable:$true] %s402_s19 }
   0x5   : > { %p1990_p3 = scmp.eq.s32.totalorder %s1897_s16, 0  ;;  %s2190_s20 = scalar_lea.vmem %s403_s19, 16 }
   0x6   : > { %p2333_p2 = pnand %p1899_p0, %p356_p1  ;;  %p2191_p6 = scmp.ne.s32.totalorder %s403_s19, %s2190_s20 }
   0x7   : > { %p2198_p10 = scmp.lt.s32.totalorder %s403_s19, %s403_s19  ;;  %p2199_p11 = scmp.lt.s32.totalorder %s2190_s20, %s2190_s20 }
   0x8   : > { %p1986_p4 = pneg %p2333_p2 }
   0x9   : > { %p2200_p12 = por %p2199_p11, %p2198_p10 }
   0xa   : > { %p1987_p5 = pnand %p1990_p3, %p1986_p4 }
   0xc   : > { %p2192_p7 = pneg %p1987_p5 }
   0xe   : > { %p2193_p8 = pnand %p2192_p7, %p2191_p6 }
  0x10   : > { %p2194_p9 = pneg %p2193_p8 }
  0x12   : > { %p2201_p13 = pnand %p2200_p12, %p2194_p9 }
  0x14   : > { %2204 = shalt.err (!%p2201_p13)
}
  0x15   : > { %s2217_s21 = smov [#allocation3]   ;;  %426 = sbr.rel (%p2333_p2) target bundleno = 1077 (0x435), region = 76 }
  0x16   : > { %1989 = dma.vmem_to_smem (!%p1987_p5), %s403_s19, 16, %s2217_s21, [#allocation4]  }
  0x1c   : > { %2210 = dma.done.wait (%p1990_p3), [#allocation4], 16  }
  0x1d   : > { %2212 = vsyncadd (%p1990_p3), [#allocation4], 4294967280 }
  0x1e   : > { %432 = sfence }
  0x1f   : > { %p473_p0 = scmp.lt.s32.totalorder %s1897_s16, 1  ;;  %v2218_v0 = vmov 0.0   ;;  %vm2843_vm0 = vcmask 1043456   ;;  %v489_v9 = vld [vmem:[%s2828_s1] sm:$0xf]  ;;  %vm490_vm1 = vcmask 162816   ;;  %v572_v14 = vlaneseq }
  0x20   : > { %565 = vmatprep.mubr.f32.mxu0 %v2218_v0  ;;  %812 = vmatprep.mubr.f32.mxu1 %v2218_v0  ;;  %s2219_s28 = smov 60   ;;  %s2220_s29 = smov 1   ;;  %vm2844_vm2 = vcmask 490496   ;;  %vm659_vm4 = vcmask 7168   ;;  %vm628_vm6 = vcmask 130048   ;;  %vm2845_vm8 = vcmask 982016  }
  0x21   : > { %s2923_s16 = smov (!%p473_p0, %s1897_s16), 1  ;;  %s2221_s30 = smov 111   ;;  %v573_v15 = vand.u32 127, %v572_v14  ;;  %vm877_vm9 = vcmask 15360   ;;  %vm605_vm12 = vcmask 138240   ;;  %vm670_vm13 = vcmask 1039360  }
  0x22   : > { %s2842_s22 = smul.u32 48, %s2923_s16  ;;  %s2222_s17 = smov 16   ;;  %vm636_vm14 = vcmask 121856   ;;  %v2448_v54 = vrot.slane %v2218_v0, 4 }
  0x23   : > { %s2223_s18 = smov 120   ;;  %s2224_s19 = smov 2   ;;  %v574_v16 = vadd.s32 128, %v573_v15  ;;  %v579_v17 = vand.u32 15, %v573_v15 }
  0x24   : > { %s2354_s25 = scalar_lea.vmem %s2827_s0, %s2842_s22  ;;  %s2225_s13 = smov 17  }
  0x25   : > { %v484_v1 = vld [vmem:[%s2354_s25 + $0x8] sm:$0xff]  ;;  %v486_v2 = vld [vmem:[%s2354_s25 + $0x18] sm:$0xff]  ;;  %v483_v3 = vld [vmem:[%s2354_s25] sm:$0xff]  ;;  %s2226_s20 = smov 127   ;;  %s2227_s21 = smov 15   ;;  %v586_v18 = vand.u32 15, %v574_v16 }
  0x26   : > { %v1944_v4 = vpack.c.bf16 %v486_v2, %v484_v1  ;;  %v485_v5 = vld [vmem:[%s2354_s25 + $0x10] sm:$0xff]  ;;  %v488_v7 = vld [vmem:[%s2354_s25 + $0x28] sm:$0xf]  ;;  %v487_v8 = vld [vmem:[%s2354_s25 + $0x20] sm:$0xf]  ;;  %s2228_s23 = smov 30  }
  0x27   : > { %v1946_v6 = vpack.c.bf16 %v485_v5, %v483_v3  ;;  %s2229_s24 = smov 32   ;;  %s2230_s26 = smov 113   ;;  %v2390_v19 = vadd.s32 4, %v579_v17  ;;  %v2394_v21 = vadd.s32 4294967295, %v579_v17  ;;  %v2396_v22 = vadd.s32 4294967295, %v586_v18 }
  0x28   : > { %1945 = vmatprep.subr.bf16.mxu0 %v1944_v4  ;;  %s2231_s27 = smov 34   ;;  %s2234_s22 = smov 4   ;;  %v2398_v24 = vadd.s32 4294967294, %v579_v17  ;;  %v2400_v25 = vadd.s32 4294967294, %v586_v18  ;;  %v2406_v29 = vadd.s32 1, %v586_v18  ;;  %v2409_v30 = vadd.s32 8, %v579_v17 }
  0x29   : > { %1947 = vmatpush1.bf16.msra.mxu0 %v1946_v6  ;;  %vm2846_vm3 = vcmp.lt.s32.totalorder %v2390_v19, 16  ;;  %vm2847_vm5 = vcmp.ge.s32.totalorder %v2394_v21, 0  ;;  %vm2848_vm7 = vcmp.ge.s32.totalorder %v2396_v22, 0  ;;  %v2411_v31 = vadd.s32 1, %v579_v17 }
  0x2a   : > { %1906 = vmatprep.subr.msk.mxu0 %vm2843_vm0, %v488_v7  ;;  %vm2850_vm10 = vcmp.ge.s32.totalorder %v2398_v24, 0  ;;  %vm831_vm11 = vcmp.ge.s32.totalorder %v2400_v25, 0  ;;  %v2420_v37 = vadd.s32 2, %v579_v17  ;;  %v2424_v41 = vadd.s32 2, %v586_v18 }
  0x2b   : > { %v2427_v42 = vadd.s32 4294967292, %v579_v17  ;;  %v2429_v43 = vadd.s32 4294967292, %v586_v18  ;;  %v2431_v44 = vadd.s32 4, %v586_v18  ;;  %v2433_v45 = vadd.s32 4294967288, %v579_v17 }
  0x2c   : > { %v2443_v50 = vadd.s32 4294967288, %v586_v18  ;;  %vm2852_vm15 = vcmp.lt.s32.totalorder %v2420_v37, 16  ;;  %v2450_v55 = vadd.s32 8, %v586_v18 }
  0x2d   : > { %1907 = vmatpush1.msk.msra.mxu0 %vm2843_vm0, %v487_v8  ;;  %vm846_vm0 = vcmask 261120  }
  0x2e   : > { %1908 = vmatmul.mubr.msk.f32.vlgmr.msra.gmra.mrb[0].mxu0 %vm490_vm1, %v489_v9  ;;  %vm2849_vm1 = vcmp.lt.s32.totalorder %v2409_v30, 16 }
  0x2f   : > { %1029 = vmatprep.mubr.f32.mxu0 %v2218_v0 }
 0x101   : > { %v2368_v10 = vpop.f32.mrb[0].mxu0 }
 0x102   : > { %1067 = vrot.lane.b32.xlu1 %v2368_v10, %s2219_s28  ;;  %v2372_v11 = vpop.f32.mrb[1].mxu0  ;;  %v1289_v33 = vrot.slane %v2368_v10, 4 }
 0x103   : > { %v2027_v12 = vpack.i.bf16 %v2372_v11, %v2368_v10  ;;  %v2057_v13 = vpack.i.bf16 %v2368_v10, %v2372_v11  ;;  %v1304_v38 = vrot.slane %v2372_v11, 4 }
 0x105   : > { %2028 = vrot.lane.b32.xlu0 %v2027_v12, %s2220_s29  ;;  %s2232_s29 = smov 96  }
 0x106   : > { %696 = vrot.lane.b32.xlu1 %v2368_v10, %s2221_s30 }
 0x109   : > { %2033 = vrot.lane.b32.xlu0 %v2027_v12, %s2222_s17  ;;  %s2233_s17 = smov 112  }
 0x10a   : > { %1249 = vrot.lane.b32.xlu1 %v2368_v10, %s2223_s18 }
 0x10d   : > { %2048 = vrot.lane.b32.xlu0 %v2027_v12, %s2224_s19  ;;  %s2235_s19 = smov 126  }
 0x10e   : > { %2038 = vrot.lane.b32.xlu1 %v2027_v12, %s2225_s13  ;;  %s2236_s13 = smov 68  }
 0x111   : > { %2058 = vrot.lane.b32.xlu0 %v2057_v13, %s2226_s20  ;;  %s2237_s20 = smov 98  }
 0x112   : > { %2043 = vrot.lane.b32.xlu1 %v2027_v12, %s2227_s21  ;;  %s2238_s21 = smov 64  }
 0x115   : > { %2068 = vrot.lane.b32.xlu0 %v2027_v12, %s2228_s23  ;;  %s2239_s23 = smov 8  }
 0x116   : > { %2053 = vrot.lane.b32.xlu1 %v2027_v12, %s2229_s24  ;;  %s2240_s24 = smov 124  }
 0x119   : > { %2078 = vrot.lane.b32.xlu0 %v2057_v13, %s2230_s26  ;;  %s2241_s26 = smov 94  }
 0x11a   : > { %2063 = vrot.lane.b32.xlu1 %v2027_v12, %s2231_s27 }
 0x11d   : > { %2088 = vrot.lane.b32.xlu0 %v2057_v13, %s2232_s29 }
 0x11e   : > { %2073 = vrot.lane.b32.xlu1 %v2057_v13, %s2233_s17 }
 0x121   : > { %2098 = vrot.lane.b32.xlu0 %v2027_v12, %s2234_s22 }
 0x122   : > { %2083 = vrot.lane.b32.xlu1 %v2057_v13, %s2235_s19 }
 0x125   : > { %2108 = vrot.lane.b32.xlu0 %v2027_v12, %s2236_s13 }
 0x126   : > { %2093 = vrot.lane.b32.xlu1 %v2057_v13, %s2237_s20 }
 0x129   : > { %1069 = vrot.lane.b32.xlu0 %v2372_v11, %s2219_s28 }
 0x12a   : > { %2103 = vrot.lane.b32.xlu1 %v2027_v12, %s2238_s21  ;;  %s1925_s21 = sld [smem:[#allocation3 + $0x1]] }
 0x12d   : > { %698 = vrot.lane.b32.xlu0 %v2372_v11, %s2221_s30 }
 0x12e   : > { %2113 = vrot.lane.b32.xlu1 %v2027_v12, %s2239_s23  ;;  %s1926_s23 = sld [smem:[#allocation3 + $0x2]] }
 0x131   : > { %2118 = vrot.lane.b32.xlu0 %v2057_v13, %s2240_s24  ;;  %s1525_s24 = sld [smem:[#allocation3]] }
 0x132   : > { %916 = vrot.lane.b32.xlu1 %v2372_v11, %s2241_s26 }
 0x135   : > { %1251 = vrot.lane.b32.xlu0 %v2372_v11, %s2223_s18 }
 0x139   : > { %914 = vrot.lane.b32.xlu0 %v2368_v10, %s2241_s26  ;;  %s1570_s26 = sld [smem:[#allocation2]] }
 0x174   : > { %v2392_v20 = vpop.permute.xlu1 %1067 }
 0x175   : > { %v1075_v46 = vsel %vm2844_vm2, 0.0, %v2392_v20  ;;  %vm2853_vm2 = vcmp.lt.s32.totalorder %v2424_v41, 16 }
 0x176   : > { %v2456_v60 = vsel %vm2846_vm3, %v1075_v46, 0.0  ;;  %vm2857_vm3 = vcmp.lt.s32.totalorder %v2406_v29, 16 }
 0x177   : > { %v2029_v23 = vpop.permute.xlu0 %2028 }
 0x178   : > { %v2031_v26 = vunpack.i.h.bf16 %v2029_v23  ;;  %v2030_v27 = vunpack.i.l.bf16 %v2029_v23  ;;  %v2403_v28 = vpop.permute.xlu1 %696 }
 0x17a   : > { %v660_v34 = vsel %vm659_vm4, %v2030_v27, %v2031_v26  ;;  %v663_v35 = vsel %vm659_vm4, 0.0, %v2030_v27  ;;  %vm854_vm4 = vcmask 244736  }
 0x17b   : > { %v2034_v32 = vpop.permute.xlu0 %2033  ;;  %v2439_v47 = vsel %vm2847_vm5, %v663_v35, 0.0  ;;  %v665_v49 = vsel %vm2848_vm7, %v660_v34, 0.0 }
 0x17c   : > { %v2418_v36 = vpop.permute.xlu1 %1249  ;;  %v2036_v39 = vunpack.i.h.bf16 %v2034_v32  ;;  %v2035_v40 = vunpack.i.l.bf16 %v2034_v32  ;;  %v714_v61 = vrot.slane %v2439_v47, 4  ;;  %v715_v63 = vrot.slane %v665_v49, 4 }
 0x17d   : > { %v1257_v62 = vsel %vm2845_vm8, 0.0, %v2418_v36 }
 0x17e   : > { %v631_v56 = vsel %vm628_vm6, 0.0, %v2035_v40  ;;  %v629_v59 = vsel %vm628_vm6, %v2035_v40, %v2036_v39  ;;  %vm823_vm6 = vcmask 277504  }
 0x17f   : > { %v2049_v48 = vpop.permute.xlu0 %2048  ;;  %v708_v6 = vrot.slane %v631_v56, 4  ;;  %v709_v12 = vrot.slane %v629_v59, 4 }
 0x180   : > { %v2051_v51 = vunpack.i.h.bf16 %v2049_v48  ;;  %v2050_v52 = vunpack.i.l.bf16 %v2049_v48  ;;  %v2039_v53 = vpop.permute.xlu1 %2038 }
 0x181   : > { %v2041_v57 = vunpack.i.h.bf16 %v2039_v53  ;;  %v2040_v58 = vunpack.i.l.bf16 %v2039_v53 }
 0x182   : > { %v878_v1 = vsel %vm877_vm9, %v2050_v52, %v2051_v51  ;;  %v881_v2 = vsel %vm877_vm9, 0.0, %v2050_v52 }
 0x183   : > { %v609_v3 = vsel %vm605_vm12, 0.0, %v2040_v58  ;;  %v2059_v4 = vpop.permute.xlu0 %2058  ;;  %v606_v5 = vsel %vm605_vm12, %v2040_v58, %v2041_v57  ;;  %v882_v17 = vsel %vm2850_vm10, %v881_v2, 0.0  ;;  %v883_v18 = vsel %vm831_vm11, %v878_v1, 0.0 }
 0x184   : > { %v2061_v7 = vunpack.i.h.bf16 %v2059_v4  ;;  %v2060_v8 = vunpack.i.l.bf16 %v2059_v4  ;;  %v2044_v9 = vpop.permute.xlu1 %2043  ;;  %v623_v15 = vsel %vm2848_vm7, %v606_v5, 0.0  ;;  %v622_v16 = vsel %vm2847_vm5, %v609_v3, 0.0  ;;  %vm2858_vm5 = vmmov %vm2857_vm3 }
 0x185   : > { %v2046_v13 = vunpack.i.h.bf16 %v2044_v9  ;;  %v2045_v14 = vunpack.i.l.bf16 %v2044_v9  ;;  %vm2855_vm12 = vcmask 1043456   ;;  %vm692_vm7 = vcmask 916480  }
 0x186   : > { %v671_v23 = vsel %vm670_vm13, %v2061_v7, %v2060_v8  ;;  %v674_v26 = vsel %vm670_vm13, %v2060_v8, 0.0  ;;  %v730_v35 = vsel %vm2855_vm12, %v623_v15, %v709_v12  ;;  %vm2856_vm8 = vmmov %vm2855_vm12  ;;  %vm910_vm13 = vcmask 785408  }
 0x187   : > { %v640_v27 = vsel %vm636_vm14, 0.0, %v2045_v14  ;;  %v2069_v32 = vpop.permute.xlu0 %2068  ;;  %v637_v34 = vsel %vm636_vm14, %v2045_v14, %v2046_v13  ;;  %v729_v39 = vsel %vm2856_vm8, %v622_v16, %v708_v6  ;;  %v676_v40 = vsel %vm2857_vm3, %v674_v26, 0.0  ;;  %vm2859_vm9 = vmmov %vm2856_vm8 }
 0x188   : > { %v2071_v46 = vunpack.i.h.bf16 %v2069_v32  ;;  %v2070_v47 = vunpack.i.l.bf16 %v2069_v32  ;;  %v2054_v48 = vpop.permute.xlu1 %2053  ;;  %v654_v49 = vsel %vm2858_vm5, %v637_v34, 0.0  ;;  %vm2860_vm14 = vcmp.lt.s32.totalorder %v2411_v31, 16  ;;  %vm2861_vm3 = vmmov %vm2856_vm8 }
 0x189   : > { %v2056_v51 = vunpack.i.h.bf16 %v2054_v48  ;;  %v2055_v52 = vunpack.i.l.bf16 %v2054_v48  ;;  %v732_v53 = vsel %vm2859_vm9, %v654_v49, %v715_v63  ;;  %v653_v56 = vsel %vm2860_vm14, %v640_v27, 0.0  ;;  %vm2863_vm9 = vmmov %vm2861_vm3 }
 0x18a   : > { %v855_v57 = vsel %vm854_vm4, %v2070_v47, %v2071_v46  ;;  %v858_v58 = vsel %vm854_vm4, 0.0, %v2070_v47  ;;  %v1948_v59 = vpack.c.bf16 %v732_v53, %v730_v35  ;;  %v731_v1 = vsel %vm2861_vm3, %v653_v56, %v714_v61  ;;  %vm2862_vm4 = vmmov %vm2860_vm14 }
 0x18b   : > { %v2492_v2 = vsel %vm2849_vm1, %v1257_v62, 0.0  ;;  %v871_v3 = vsel %vm2852_vm15, %v858_v58, 0.0  ;;  %v849_v4 = vsel %vm846_vm0, 0.0, %v2055_v52  ;;  %v2079_v63 = vpop.permute.xlu0 %2078  ;;  %v1950_v5 = vpack.c.bf16 %v731_v1, %v729_v39  ;;  %vm2864_vm12 = vmmov %vm2861_vm3 }
 0x18c   : > { %vm2851_vm5 = vcmask 31744   ;;  %v932_v6 = vrot.slane %v882_v17, 4  ;;  %v933_v7 = vrot.slane %v883_v18, 4  ;;  %v721_v8 = vrot.slane %v676_v40, 4  ;;  %v2064_v12 = vpop.permute.xlu1 %2063  ;;  %1949 = vmatprep.subr.bf16.mxu1 %v1948_v59 }
 0x18d   : > { %v847_v9 = vsel %vm846_vm0, %v2055_v52, %v2056_v51  ;;  %vm888_vm8 = vcmask 1031168   ;;  %v2066_v61 = vunpack.i.h.bf16 %v2064_v12  ;;  %v2065_v13 = vunpack.i.l.bf16 %v2064_v12  ;;  %1951 = vmatpush1.bf16.msra.mxu1 %v1950_v5 }
 0x18e   : > { %v2500_v62 = vsel %vm2862_vm4, %v671_v23, 0.0  ;;  %v872_v14 = vsel %vm2853_vm2, %v855_v57, 0.0  ;;  %v949_v15 = vsel %vm2863_vm9, %v871_v3, %v932_v6  ;;  %v926_v16 = vrot.slane %v849_v4, 4  ;;  %vm2865_vm4 = vmmov %vm2861_vm3 }
 0x18f   : > { %v2081_v17 = vunpack.i.h.bf16 %v2079_v63  ;;  %v2080_v18 = vunpack.i.l.bf16 %v2079_v63  ;;  %vm1047_vm0 = vcmp.ge.s32.totalorder %v2427_v42, 0  ;;  %v927_v26 = vrot.slane %v847_v9, 4  ;;  %v2089_v34 = vpop.permute.xlu0 %2088 }
 0x190   : > { %v824_v27 = vsel %vm823_vm6, %v2065_v13, %v2066_v61  ;;  %v827_v32 = vsel %vm823_vm6, 0.0, %v2065_v13  ;;  %v950_v23 = vsel %vm2864_vm12, %v872_v14, %v933_v7  ;;  %vm1040_vm14 = vcmask 556032   ;;  %v2074_v46 = vpop.permute.xlu1 %2073 }
 0x191   : > { %v840_v35 = vsel %vm2850_vm10, %v827_v32, 0.0  ;;  %v2091_v39 = vunpack.i.h.bf16 %v2089_v34  ;;  %v2090_v40 = vunpack.i.l.bf16 %v2089_v34  ;;  %v2513_v47 = vsel %vm2861_vm3, %v2372_v11, %v721_v8  ;;  %vm2868_vm10 = vmmov %vm2861_vm3 }
 0x192   : > { %v947_v48 = vsel %vm2865_vm4, %v840_v35, %v926_v16  ;;  %v2076_v49 = vunpack.i.h.bf16 %v2074_v46  ;;  %v2075_v51 = vunpack.i.l.bf16 %v2074_v46  ;;  %v841_v52 = vsel %vm831_vm11, %v824_v27, 0.0 }
 0x193   : > { %vm1048_vm6 = vcmp.ge.s32.totalorder %v2429_v43, 0  ;;  %vm899_vm9 = vcmask 801792   ;;  %vm2866_vm12 = vcmask 924672   ;;  %v948_v57 = vsel %vm2868_vm10, %v841_v52, %v927_v26  ;;  %v2099_v63 = vpop.permute.xlu0 %2098 }
 0x194   : > { %v682_v53 = vsel %vm2866_vm12, %v2081_v17, %v2080_v18  ;;  %vm2867_vm1 = vmmov %vm2866_vm12  ;;  %v720_v58 = vrot.slane %v2500_v62, 4  ;;  %v2524_v59 = vsel %vm910_vm13, %v2091_v39, %v2090_v40  ;;  %v2527_v1 = vsel %vm910_vm13, %v2090_v40, 0.0  ;;  %v2084_v8 = vpop.permute.xlu1 %2083 }
 0x195   : > { %v685_v56 = vsel %vm2867_vm1, %v2080_v18, 0.0  ;;  %v693_v3 = vsel %vm692_vm7, %v2076_v49, %v2075_v51  ;;  %v695_v4 = vsel %vm692_vm7, %v2075_v51, 0.0  ;;  %v2101_v6 = vunpack.i.h.bf16 %v2099_v63  ;;  %vm2870_vm13 = vmmov %vm2865_vm4 }
 0x196   : > { %v726_v5 = vrot.slane %v695_v4, 4  ;;  %v2100_v7 = vunpack.i.l.bf16 %v2099_v63  ;;  %v1958_v9 = vpack.c.bf16 %v949_v15, %v947_v48  ;;  %vm2869_vm10 = vcmp.ge.s32.totalorder %v2396_v22, 0  ;;  %vm2872_vm12 = vmmov %vm2870_vm13 }
 0x197   : > { %v687_v12 = vsel %vm2869_vm10, %v685_v56, 0.0  ;;  %v2086_v61 = vunpack.i.h.bf16 %v2084_v8  ;;  %v2085_v13 = vunpack.i.l.bf16 %v2084_v8  ;;  %v1956_v62 = vpack.c.bf16 %v950_v23, %v948_v57  ;;  %v2109_v22 = vpop.permute.xlu0 %2108  ;;  %vm2873_vm10 = vmmov %vm2872_vm12 }
 0x198   : > { %vm1063_vm1 = vcmask 523264   ;;  %vm700_vm3 = vcmask 908288   ;;  %v943_v14 = vrot.slane %v2524_v59, 4  ;;  %v944_v16 = vrot.slane %v2527_v1, 4  ;;  %v2094_v39 = vpop.permute.xlu1 %2093 }
 0x199   : > { %v725_v17 = vrot.slane %v693_v3, 4  ;;  %v1098_v18 = vsel %vm2851_vm5, 0.0, %v2100_v7  ;;  %vm1081_vm7 = vcmp.lt.s32.totalorder %v2431_v44, 16  ;;  %v889_v26 = vsel %vm888_vm8, %v2086_v61, %v2085_v13  ;;  %1957 = vmatprep.subr.bf16.mxu0 %v1956_v62  ;;  %v1150_v44 = vld [vmem:[%s2831_s4] sm:$0xf] }
 0x19a   : > { %v892_v15 = vsel %vm888_vm8, %v2085_v13, 0.0  ;;  %v736_v27 = vsel %vm2870_vm13, %v687_v12, %v726_v5  ;;  %vm2871_vm4 = vcmp.ge.s32.totalorder %v2394_v21, 0  ;;  %v1095_v34 = vsel %vm2851_vm5, %v2100_v7, %v2101_v6  ;;  %1959 = vmatpush1.bf16.msra.mxu0 %v1958_v9 }
 0x19b   : > { %v686_v32 = vsel %vm2871_vm4, %v682_v53, 0.0  ;;  %v894_v23 = vsel %vm2853_vm2, %v892_v15, 0.0  ;;  %v2111_v35 = vunpack.i.h.bf16 %v2109_v22  ;;  %v733_v40 = vsel %vm2872_vm12, %v2368_v10, %v720_v58  ;;  %v1070_v4 = vpop.permute.xlu0 %1069 }
 0x19c   : > { %v2549_v46 = vsel %vm1047_vm0, %v1098_v18, 0.0  ;;  %v893_v48 = vsel %vm2852_vm15, %v889_v26, 0.0  ;;  %v2110_v21 = vunpack.i.l.bf16 %v2109_v22  ;;  %v2096_v49 = vunpack.i.h.bf16 %v2094_v39  ;;  %v2104_v7 = vpop.permute.xlu1 %2103 }
 0x19d   : > { %vm1234_vm8 = vcmask 64512   ;;  %v1113_v51 = vsel %vm1040_vm14, %v2111_v35, 0.0  ;;  %v2095_v52 = vunpack.i.l.bf16 %v2094_v39  ;;  %v1952_v53 = vpack.c.bf16 %v736_v27, %v2513_v47 }
 0x19e   : > { %v735_v56 = vsel %vm2873_vm10, %v686_v32, %v725_v17  ;;  %vm918_vm13 = vcmask 769024   ;;  %vm738_vm4 = vcmask 293888   ;;  %v939_v57 = vrot.slane %v894_v23, 4 }
 0x19f   : > { %v1041_v58 = vsel %vm1040_vm14, %v2110_v21, %v2111_v35  ;;  %v1044_v1 = vsel %vm1040_vm14, 0.0, %v2110_v21  ;;  %v1954_v3 = vpack.c.bf16 %v735_v56, %v733_v40  ;;  %vm1238_vm12 = vcmp.ge.s32.totalorder %v2433_v45, 0  ;;  %1953 = vmatprep.subr.bf16.mxu1 %v1952_v53  ;;  %v699_v22 = vpop.permute.xlu0 %698 }
 0x1a0   : > { %vm1239_vm5 = vcmp.ge.s32.totalorder %v2443_v50, 0  ;;  %v1129_v63 = vrot.slane %v2549_v46, 4  ;;  %v2563_v47 = vsel %vm1048_vm6, %v1095_v34, 0.0  ;;  %v900_v5 = vsel %vm899_vm9, %v2096_v49, %v2095_v52  ;;  %v2114_v32 = vpop.permute.xlu1 %2113  ;;  %v737_v49 = vld [vmem:[%s2829_s2] sm:$0xf] }
 0x1a1   : > { %v903_v6 = vsel %vm899_vm9, %v2095_v52, 0.0  ;;  %vm1105_vm10 = vcmask 1014784   ;;  %v938_v8 = vrot.slane %v893_v48, 4  ;;  %v2569_v9 = vsel %vm1048_vm6, %v1113_v51, 0.0  ;;  %1955 = vmatpush1.bf16.msra.mxu1 %v1954_v3 }
 0x1a2   : > { %v2573_v12 = vsel %vm1047_vm0, %v1044_v1, 0.0  ;;  %v905_v61 = vsel %vm831_vm11, %v903_v6, 0.0  ;;  %v2579_v13 = vsel %vm1047_vm0, %v1041_v58, 0.0  ;;  %vm2874_vm14 = vcmp.ge.s32.totalorder %v2398_v24, 0 }
 0x1a3   : > { %v904_v62 = vsel %vm2874_vm14, %v900_v5, 0.0  ;;  %vm2875_vm9 = vcmask 490496   ;;  %v2106_v18 = vunpack.i.h.bf16 %v2104_v7  ;;  %v2105_v15 = vunpack.i.l.bf16 %v2104_v7 }
 0x1a4   : > { %v2585_v17 = vsel %vm2875_vm9, %v2392_v20, %v1070_v4  ;;  %vm2876_vm15 = vmmov %vm2875_vm9  ;;  %vm2877_vm11 = vcmask 1043456   ;;  %v701_v24 = vsel %vm700_vm3, %v2403_v28, %v699_v22  ;;  %v704_v20 = vsel %vm700_vm3, %v699_v22, 0.0 }
 0x1a5   : > { %v2588_v26 = vsel %vm2876_vm15, %v1070_v4, 0.0  ;;  %v952_v25 = vsel %vm2877_vm11, %v2372_v11, %v939_v57  ;;  %vm2878_vm2 = vmmov %vm2877_vm11  ;;  %v2594_v27 = vsel %vm1063_vm1, %v2106_v18, 0.0  ;;  %v1089_v23 = vsel %vm1081_vm7, %v2585_v17, 0.0  ;;  %v917_v4 = vpop.permute.xlu1 %916 }
 0x1a6   : > { %v954_v42 = vsel %vm2878_vm2, %v905_v61, %v944_v16  ;;  %v2603_v35 = vsel %vm1063_vm1, %v2105_v15, %v2106_v18  ;;  %v1066_v39 = vsel %vm1063_vm1, 0.0, %v2105_v15  ;;  %vm2879_vm2 = vcmp.lt.s32.totalorder %v2411_v31, 16  ;;  %vm2881_vm3 = vmmov %vm2877_vm11 }
 0x1a7   : > { %v1960_v34 = vpack.c.bf16 %v954_v42, %v952_v25  ;;  %v705_v16 = vsel %vm2879_vm2, %v701_v24, 0.0  ;;  %vm1263_vm15 = vcmp.lt.s32.totalorder %v2450_v55, 16  ;;  %v1140_v28 = vrot.slane %v2594_v27, 4  ;;  %vm2882_vm1 = vmmov %vm2881_vm3 }
 0x1a8   : > { %vm2880_vm0 = vcmp.lt.s32.totalorder %v2406_v29, 16  ;;  %v2116_v48 = vunpack.i.h.bf16 %v2114_v32  ;;  %v951_v21 = vsel %vm2881_vm3, %v2368_v10, %v938_v8  ;;  %v1123_v51 = vrot.slane %v1066_v39, 4  ;;  %vm2883_vm14 = vmmov %vm2882_vm1  ;;  %v2119_v29 = vpop.permute.xlu0 %2118 }
 0x1a9   : > { %v706_v40 = vsel %vm2880_vm0, %v704_v20, 0.0  ;;  %1961 = vmatprep.subr.bf16.mxu0 %v1960_v34  ;;  %v1124_v31 = vrot.slane %v2603_v35, 4  ;;  %v2115_v52 = vunpack.i.l.bf16 %v2114_v32  ;;  %v953_v53 = vsel %vm2882_vm1, %v904_v62, %v943_v14  ;;  %vm2884_vm9 = vmmov %vm2882_vm1 }
 0x1aa   : > { %1909 = vmatprep.subr.msk.mxu1 %vm2883_vm14, %v706_v40  ;;  %v1283_v56 = vsel %vm1234_vm8, %v2116_v48, 0.0  ;;  %v1962_v57 = vpack.c.bf16 %v953_v53, %v951_v21  ;;  %v2121_v1 = vunpack.i.h.bf16 %v2119_v29  ;;  %v2120_v3 = vunpack.i.l.bf16 %v2119_v29  ;;  %vm2887_vm11 = vmmov %vm2882_vm1 }
 0x1ab   : > { %1910 = vmatpush1.msk.msra.mxu1 %vm2884_vm9, %v705_v16  ;;  %v1235_v5 = vsel %vm1234_vm8, 0.0, %v2115_v52  ;;  %v1274_v6 = vsel %vm1234_vm8, %v2115_v52, %v2116_v48  ;;  %v922_v7 = vsel %vm918_vm13, %v917_v4, 0.0  ;;  %v1058_v59 = vsel %vm1048_vm6, %v1041_v58, 0.0  ;;  %vm2890_vm2 = vmmov %vm2882_vm1 }
 0x1ac   : > { %1911 = vmatmul.mubr.msk.f32.vlgmr.msra.gmra.mrb[0].mxu1 %vm738_vm4, %v737_v49  ;;  %v1285_v14 = vsel %vm1239_vm5, %v1283_v56, 0.0  ;;  %v1276_v8 = vsel %vm1238_vm12, %v1235_v5, 0.0  ;;  %v1277_v61 = vsel %vm1239_vm5, %v1274_v6, 0.0  ;;  %1963 = vmatpush1.bf16.msra.mxu0 %v1962_v57  ;;  %v1130_v62 = vrot.slane %v2563_v47, 4  ;;  %v1252_v22 = vpop.permute.xlu0 %1251  ;;  %vm2891_vm0 = vmmov %vm2882_vm1 }
 0x1ad   : > { %1224 = vmatprep.mubr.f32.mxu1 %v2218_v0  ;;  %v1248_v43 = vsel %vm1239_vm5, %v1235_v5, 0.0  ;;  %v1294_v58 = vrot.slane %v1276_v8, 4  ;;  %v1106_v18 = vsel %vm1105_vm10, %v2121_v1, %v2120_v3  ;;  %v1109_v15 = vsel %vm1105_vm10, %v2120_v3, 0.0  ;;  %vm2888_vm5 = vmmov %vm2882_vm1 }
 0x1ae   : > { %vm2885_vm6 = vcmp.lt.s32.totalorder %v2390_v19, 16  ;;  %v1111_v42 = vsel %vm1081_vm7, %v1109_v15, 0.0  ;;  %vm2886_vm8 = vcmp.lt.s32.totalorder %v2424_v41, 16  ;;  %v1143_v27 = vsel %vm2887_vm11, %v1058_v59, %v1124_v31  ;;  %vm2889_vm10 = vmmov %vm2882_vm1 }
 0x1af   : > { %v1110_v25 = vsel %vm2885_vm6, %v1106_v18, 0.0  ;;  %v924_v47 = vsel %vm2886_vm8, %v922_v7, 0.0  ;;  %v1284_v50 = vsel %vm1238_vm12, %v1274_v6, 0.0  ;;  %v1295_v24 = vrot.slane %v1277_v61, 4  ;;  %vm2894_vm1 = vmmov %vm2891_vm0 }
 0x1b0   : > { %v1136_v20 = vrot.slane %v1111_v42, 4  ;;  %v1145_v32 = vsel %vm2888_vm5, %v1089_v23, %v1130_v62  ;;  %1912 = vmatprep.subr.msk.mxu0 %vm2889_vm10, %v924_v47  ;;  %v1135_v34 = vrot.slane %v1110_v25, 4  ;;  %v1142_v39 = vsel %vm2890_vm2, %v2573_v12, %v1123_v51  ;;  %v915_v48 = vpop.permute.xlu0 %914  ;;  %vm2895_vm14 = vmmov %vm2891_vm0 }
 0x1b1   : > { %v1964_v35 = vpack.c.bf16 %v1145_v32, %v1143_v27  ;;  %v1144_v41 = vsel %vm2891_vm0, %v2456_v60, %v1129_v63  ;;  %vm2892_vm3 = vcmask 982016   ;;  %v1308_v21 = vsel %vm2895_vm14, %v2492_v2, %v1294_v58  ;;  %vm2897_vm6 = vmmov %vm2891_vm0  ;;  %v955_v2 = vld [vmem:[%s2830_s3] sm:$0xf] }
 0x1b2   : > { %v1966_v16 = vpack.c.bf16 %v1144_v41, %v1142_v39  ;;  %v1254_v45 = vsel %vm2892_vm3, %v2418_v36, %v1252_v22  ;;  %vm2893_vm12 = vmmov %vm2892_vm3  ;;  %v1147_v23 = vsel %vm2894_vm1, %v2372_v11, %v1136_v20  ;;  %vm2896_vm9 = vcmp.lt.s32.totalorder %v2409_v30, 16 }
 0x1b3   : > { %v1279_v40 = vsel %vm2893_vm12, %v1252_v22, 0.0  ;;  %1965 = vmatprep.subr.bf16.mxu1 %v1964_v35  ;;  %v1271_v46 = vsel %vm1263_vm15, %v1254_v45, 0.0  ;;  %v1280_v60 = vsel %vm2896_vm9, %v1254_v45, 0.0  ;;  %v919_v49 = vsel %vm918_vm13, %v915_v48, %v917_v4  ;;  %vm2898_vm8 = vmmov %vm2891_vm0 }
 0x1b4   : > { %v1281_v63 = vsel %vm1263_vm15, %v1279_v40, 0.0  ;;  %1967 = vmatpush1.bf16.msra.mxu1 %v1966_v16  ;;  %v1300_v36 = vrot.slane %v1280_v60, 4  ;;  %v1149_v51 = vsel %vm2897_vm6, %v2569_v9, %v1140_v28  ;;  %vm1918_vm11 = vmneg %vm2898_vm8  ;;  %vm2899_vm5 = vcmp.lt.s32.totalorder %v2420_v37, 16 }
 0x1b5   : > { %v1301_v12 = vrot.slane %v1281_v63, 4  ;;  %v923_v52 = vsel %vm2899_vm5, %v919_v49, 0.0  ;;  %v1968_v53 = vpack.c.bf16 %v1149_v51, %v1147_v23  ;;  %vm2900_vm15 = vmmov %vm2891_vm0  ;;  %v1307_v28 = vsel %vm2891_vm0, %v1248_v43, %v1289_v33 }
 0x1b6   : > { %v1146_v55 = vsel %vm2900_vm15, %v2368_v10, %v1135_v34  ;;  %vm2901_vm10 = vmmov %vm2891_vm0  ;;  %vm2242_vm12 = vmmov 1   ;;  %v1974_v1 = vpack.c.bf16 %v1308_v21, %v2448_v54  ;;  %v2243_v16 = vmov 0  }
 0x1b7   : > { %v1148_v29 = vsel %vm2901_vm10, %v2579_v13, %v1124_v31  ;;  %vm2902_vm13 = vmmov %vm2891_vm0  ;;  %1969 = vmatprep.subr.bf16.mxu1 %v1968_v53  ;;  %v1121_v31 = vsel %vm1081_vm7, %v2588_v26, 0.0  ;;  %vm2909_vm7 = vcmp.lt.s32.totalorder %v2390_v19, 16  ;;  %v1314_v19 = vld [vmem:[%s2832_s5] sm:$0xf]  ;;  %vm2913_vm10 = vcmp.lt.s32.totalorder %v2409_v30, 16  ;;  %2123 = vset.pattern.permute.xlu0 %v2243_v16 }
 0x1b8   : > { %v1310_v56 = vsel %vm2902_vm13, %v2368_v10, %v1300_v36  ;;  %vm2903_vm2 = vmmov %vm2891_vm0  ;;  %v1970_v9 = vpack.c.bf16 %v1148_v29, %v1146_v55  ;;  %vm2914_vm13 = vcmask 31744   ;;  %2122 = vset.pattern.permute.xlu1 %v2243_v16  ;;  %v1531_v60 = vstv %s1925_s21 }
 0x1b9   : > { %1913 = vmatpush1.msk.msra.mxu0 %vm2903_vm2, %v923_v52  ;;  %vm2904_vm3 = vmmov %vm2891_vm0  ;;  %v1551_v63 = vstv %s1926_s23 }
 0x1ba   : > { %v1309_v37 = vsel %vm2904_vm3, %v1271_v46, %v1295_v24  ;;  %1914 = vmatmul.mubr.msk.f32.vlgmr.msra.gmra.mrb[2].mxu0 %vm738_vm4, %v955_v2  ;;  %vm1975_vm1 = vmpackc.low %vm2242_vm12, %vm1918_vm11  ;;  %1971 = vmatpush1.bf16.msra.mxu1 %v1970_v9  ;;  %v1526_v2 = vstv %s1525_s24 }
 0x1bb   : > { %v1972_v57 = vpack.c.bf16 %v1309_v37, %v1307_v28  ;;  %vm2905_vm14 = vmmov %vm2891_vm0  ;;  %1387 = vmatprep.mubr.f32.mxu0 %v2218_v0 }
 0x1bc   : > { %v1311_v13 = vsel %vm2905_vm14, %v2372_v11, %v1301_v12  ;;  %vm2906_vm9 = vmmov %vm2891_vm0 }
 0x1bd   : > { %v1313_v33 = vsel %vm2906_vm9, %v1285_v14, %v2448_v54  ;;  %vm2907_vm6 = vmmov %vm2891_vm0  ;;  %1973 = vmatprep.subr.bf16.mxu0 %v1972_v57  ;;  %v1120_v54 = vsel %vm2909_vm7, %v2585_v17, 0.0  ;;  %v1286_v17 = vsel %vm2913_vm10, %v1279_v40, 0.0  ;;  %vm1513_vm9 = vcmask 1040384  }
 0x1be   : > { %v1312_v3 = vsel %vm2907_vm6, %v1284_v50, %v1304_v38  ;;  %vm2908_vm8 = vmmov %vm2891_vm0  ;;  %v1977_v4 = vpack.c.bf16 %v1313_v33, %v1311_v13  ;;  %1976 = vmatpush1.bf16.msk.msra.mxu0 %vm1975_vm1, %v1974_v1  ;;  %v1394_v38 = vld [vmem:[%s2833_s6] sm:$0xf]  ;;  %vm1523_vm6 = vcmask 1044480   ;;  %vm1558_vm7 = vcmask 1045504  }
 0x1bf   : > { %1915 = vmatprep.subr.msk.mxu1 %vm2908_vm8, %v1121_v31  ;;  %v1979_v5 = vpack.c.bf16 %v1312_v3, %v1310_v56  ;;  %vm2910_vm11 = vmmov %vm2891_vm0  ;;  %vm1538_vm8 = vcmask 1046528   ;;  %v1571_v3 = vstv %s1570_s26 }
 0x1c0   : > { %1978 = vmatprep.subr.bf16.mxu0 %v1977_v4  ;;  %1916 = vmatpush1.msk.msra.mxu1 %vm2910_vm11, %v1120_v54  ;;  %vm2911_vm5 = vmmov %vm2891_vm0 }
 0x1c1   : > { %1917 = vmatmul.mubr.msk.f32.vlgmr.msra.gmra.mrb[2].mxu1 %vm738_vm4, %v1150_v44  ;;  %1922 = vmatprep.subr.msk.mxu1 %vm2911_vm5, %v2372_v11  ;;  %vm2912_vm15 = vmmov %vm2891_vm0 }
 0x1c2   : > { %1980 = vmatpush1.bf16.msra.mxu0 %v1979_v5  ;;  %1923 = vmatpush1.msk.msra.mxu1 %vm2912_vm15, %v2368_v10  ;;  %vm2915_vm2 = vmmov %vm2891_vm0 }
 0x1c3   : > { %1331 = vmatprep.subr.mxu0 %v2218_v0  ;;  %1466 = vmatprep.mubr.f32.mxu1 %v2218_v0  ;;  %vm2916_vm3 = vmmov %vm2891_vm0 }
 0x1c4   : > { %vm2918_vm12 = vmmov %vm2891_vm0 }
 0x1c5   : > { %1924 = vmatmul.mubr.msk.f32.vlgmr.msra.gmra.mrb[4].mxu1 %vm2914_vm13, %v1394_v38  ;;  %vm2919_vm1 = vmmov %vm2891_vm0 }
 0x1c6   : > { %1920 = vmatpush1.msk.msra.mxu0 %vm2915_vm2, %v1286_v17  ;;  %vm2920_vm14 = vmmov %vm2891_vm0 }
 0x1c7   : > { %1921 = vmatmul.mubr.msk.f32.vlgmr.msra.gmra.mrb[4].mxu0 %vm738_vm4, %v1314_v19  ;;  %vm2917_vm4 = vmmov %vm2891_vm0 }
 0x27f   : > { %v814_v10 = vpop.f32.mrb[0].mxu1 }
 0x280   : > { %v816_v11 = vpop.f32.mrb[1].mxu1 }
 0x28d   : > { %v1031_v26 = vpop.f32.mrb[2].mxu0 }
 0x28e   : > { %v1481_v6 = vrot.slane %v1031_v26, 4  ;;  %v1033_v7 = vpop.f32.mrb[3].mxu0 }
 0x28f   : > { %v1482_v59 = vrot.slane %v1033_v7, 4 }
 0x290   : > { %v2732_v0 = vsel %vm2891_vm0, %v814_v10, %v1481_v6 }
 0x291   : > { %v2735_v14 = vsel %vm2916_vm3, %v816_v11, %v1482_v59 }
 0x292   : > { %v1495_v41 = vadd.f32 %v2735_v14, %v2732_v0 }
 0x294   : > { %v1226_v30 = vpop.f32.mrb[2].mxu1 }
 0x295   : > { %v1473_v8 = vadd.f32 %v1226_v30, %v1031_v26  ;;  %v1228_v61 = vpop.f32.mrb[3].mxu1 }
 0x296   : > { %v1474_v62 = vadd.f32 %v1228_v61, %v1033_v7 }
 0x298   : > { %v1468_v43 = vpop.f32.mrb[4].mxu1 }
 0x299   : > { %v1470_v58 = vpop.f32.mrb[5].mxu1 }
 0x29a   : > { %v1389_v18 = vpop.f32.mrb[4].mxu0 }
 0x29b   : > { %v1475_v15 = vadd.f32 %v1473_v8, %v1389_v18  ;;  %v1391_v22 = vpop.f32.mrb[5].mxu0 }
 0x29c   : > { %v1476_v25 = vadd.f32 %v1474_v62, %v1391_v22 }
 0x29d   : > { %v1487_v42 = vrot.slane %v1475_v15, 4  ;;  %v2737_v47 = vadd.f32 %v1475_v15, %v1468_v43 }
 0x29e   : > { %v1488_v27 = vrot.slane %v1476_v25, 4  ;;  %v2739_v50 = vadd.f32 %v1476_v25, %v1470_v58 }
 0x29f   : > { %v2742_v24 = vsel %vm2917_vm4, %v1473_v8, %v1487_v42  ;;  %v1501_v20 = vsel %vm2918_vm12, %v2737_v47, 0.0 }
 0x2a0   : > { %v2747_v32 = vsel %vm2919_vm1, %v1474_v62, %v1488_v27  ;;  %v1502_v34 = vsel %vm2920_vm14, %v2739_v50, 0.0 }
 0x2a1   : > { %v1498_v35 = vadd.f32 %v2747_v32, %v2742_v24  ;;  %v1503_v39 = vadd.f32 %v1502_v34, %v1501_v20 }
 0x2a3   : > { %1499 = vadd.xlane.f32.xlu1 %v1498_v35  ;;  %1504 = vadd.xlane.f32.xlu0 %v1503_v39 }
 0x2a7   : > { %1496 = vadd.xlane.f32.xlu0 %v1495_v41  ;;  %v1705_v41 = vld [vmem:[%s2836_s9 + $0x8] sm:$0xff] }
 0x330   : > { %v1500_v45 = vpop.xlane.xlu1 %1499  ;;  %v1505_v40 = vpop.xlane.xlu0 %1504 }
 0x331   : > { %v1508_v48 = vmul.f32 0.00390625, %v1500_v45  ;;  %v1509_v23 = vmul.f32 0.00390625, %v1505_v40  ;;  %v1617_v45 = vld [vmem:[%s2834_s7] sm:$0xff] }
 0x332   : > { %v1734_v40 = vld [vmem:[%s2837_s10] sm:$0xff] }
 0x333   : > { %v1515_v21 = vrot.slane %v1508_v48, 7  ;;  %v1517_v46 = vrot.slane %v1509_v23, 7  ;;  %v1618_v48 = vld [vmem:[%s2834_s7 + $0x8] sm:$0xff]  ;;  %v1736_v23 = vld [vmem:[%s2837_s10 + $0x10] sm:$0xf] }
 0x334   : > { %v1497_v36 = vpop.xlane.xlu0 %1496 }
 0x335   : > { %v1518_v12 = vsel %vm1513_vm9, %v1515_v21, %v1517_v46  ;;  %v1507_v49 = vmul.f32 0.00390625, %v1497_v36  ;;  %v1759_v46 = vld [vmem:[%s2838_s11 + $0x8] sm:$0xff]  ;;  %v1616_v36 = vld [vmem:[%s2835_s8 + $0x10] sm:$0xf] }
 0x336   : > { %v1524_v51 = vsel %vm1523_vm6, %v1518_v12, 0.0  ;;  %v1704_v12 = vld [vmem:[%s2836_s9] sm:$0xff] }
 0x337   : > { %v1534_v52 = vmul.f32 %v1531_v60, %v1524_v51  ;;  %v1554_v53 = vmul.f32 %v1551_v63, %v1524_v51  ;;  %v1514_v55 = vrot.slane %v1507_v49, 7  ;;  %v1529_v29 = vmul.f32 %v1526_v2, %v1524_v51  ;;  %v1706_v49 = vld [vmem:[%s2836_s9 + $0x10] sm:$0xf]  ;;  %v1735_v51 = vld [vmem:[%s2837_s10 + $0x8] sm:$0xff] }
 0x339   : > { %v1542_v56 = vrot.slane %v1534_v52, 1  ;;  %v1516_v9 = vsel %vm1513_vm9, %v1514_v55, %v1515_v21  ;;  %v1522_v28 = vsel %vm1513_vm9, 0.0, %v1514_v55  ;;  %v1562_v31 = vrot.slane %v1554_v53, 2  ;;  %v1619_v21 = vld [vmem:[%s2834_s7 + $0x10] sm:$0xf] }
 0x33a   : > { %v1532_v37 = vmul.f32 %v1531_v60, %v1522_v28  ;;  %v1533_v57 = vmul.f32 %v1531_v60, %v1516_v9  ;;  %v1552_v1 = vmul.f32 %v1551_v63, %v1522_v28  ;;  %v1553_v33 = vmul.f32 %v1551_v63, %v1516_v9  ;;  %v1614_v60 = vld [vmem:[%s2835_s8] sm:$0xff]  ;;  %v1615_v63 = vld [vmem:[%s2835_s8 + $0x8] sm:$0xff]  ;;  %v1760_v52 = vld [vmem:[%s2838_s11 + $0x10] sm:$0xf] }
 0x33b   : > { %v1549_v13 = vadd.f32 %v1542_v56, %v1529_v29  ;;  %v1527_v4 = vmul.f32 %v1526_v2, %v1522_v28  ;;  %v1528_v38 = vmul.f32 %v1526_v2, %v1516_v9  ;;  %v1758_v2 = vld [vmem:[%s2838_s11] sm:$0xff] }
 0x33c   : > { %v1539_v5 = vrot.slane %v1532_v37, 1  ;;  %v1540_v44 = vrot.slane %v1533_v57, 1  ;;  %v1559_v19 = vrot.slane %v1552_v1, 2  ;;  %v1560_v17 = vrot.slane %v1553_v33, 2 }
 0x33d   : > { %v1569_v54 = vadd.f32 %v1562_v31, %v1549_v13 }
 0x33e   : > { %v1541_v10 = vsel %vm1538_vm8, %v1539_v5, %v1540_v44  ;;  %v1543_v11 = vsel %vm1538_vm8, %v1540_v44, %v1542_v56  ;;  %v1561_v59 = vsel %vm1558_vm7, %v1559_v19, %v1560_v17  ;;  %v1563_v30 = vsel %vm1558_vm7, %v1560_v17, %v1562_v31 }
 0x33f   : > { %v1574_v26 = vadd.f32 %v1571_v3, %v1569_v54  ;;  %v1547_v6 = vadd.f32 %v1541_v10, %v1527_v4  ;;  %v1548_v7 = vadd.f32 %v1543_v11, %v1528_v38 }
 0x341   : > { %v1567_v8 = vadd.f32 %v1561_v59, %v1547_v6  ;;  %v1568_v61 = vadd.f32 %v1563_v30, %v1548_v7  ;;  %v1929_v62 = vmul.f32 -1.442695, %v1574_v26 }
 0x343   : > { %v1572_v43 = vadd.f32 %v1571_v3, %v1567_v8  ;;  %v1573_v58 = vadd.f32 %v1571_v3, %v1568_v61  ;;  %2124 = vpow2.f32 %v1929_v62 }
 0x345   : > { %v1927_v18 = vmul.f32 -1.442695, %v1572_v43  ;;  %v1928_v15 = vmul.f32 -1.442695, %v1573_v58 }
 0x347   : > { %2126 = vpow2.f32 %v1927_v18 }
 0x348   : > { %2128 = vpow2.f32 %v1928_v15 }
 0x34d   : > { %v2125_v22 = vpop.eup %2124 }
 0x34e   : > { %v1586_v34 = vadd.f32 1.0, %v2125_v22 }
 0x351   : > { %v2127_v25 = vpop.eup %2126 }
 0x352   : > { %v2129_v42 = vpop.eup %2128  ;;  %v1584_v27 = vadd.f32 1.0, %v2127_v25 }
 0x353   : > { %v1585_v20 = vadd.f32 1.0, %v2129_v42 }
 0x354   : > { %2130 = vrcp.f32 %v1584_v27 }
 0x355   : > { %2132 = vrcp.f32 %v1585_v20 }
 0x356   : > { %2134 = vrcp.f32 %v1586_v34 }
 0x35e   : > { %v2131_v35 = vpop.eup %2130 }
 0x35f   : > { %v2133_v39 = vpop.eup %2132  ;;  %1595 = vperm.xlu1 %2122, %v2131_v35  }
 0x360   : > { %1600 = vperm.xlu0 %2123, %v2133_v39   ;;  %v2135_v16 = vpop.eup %2134 }
 0x363   : > { %1605 = vperm.xlu1 %2122, %v2135_v16  }
 0x364   : > { %1714 = vperm.xlu0 %2123, %v1705_v41  }
 0x367   : > { %1622 = vperm.xlu1 %2122, %v1617_v45  }
 0x368   : > { %1739 = vperm.xlu0 %2123, %v1734_v40  }
 0x36b   : > { %1627 = vperm.xlu1 %2122, %v1618_v48  }
 0x36c   : > { %1749 = vperm.xlu0 %2123, %v1736_v23  }
 0x36f   : > { %1632 = vperm.xlu1 %2122, %v1619_v21  }
 0x370   : > { %1768 = vperm.xlu0 %2123, %v1759_v46  }
 0x373   : > { %1685 = vperm.xlu1 %2122, %v1614_v60  }
 0x377   : > { %1690 = vperm.xlu1 %2122, %v1615_v63   ;;  %v2184_v63 = vld [vmem:[%s2354_s25] sm:$0xff] }
 0x37b   : > { %1695 = vperm.xlu1 %2122, %v1616_v36  }
 0x37f   : > { %1709 = vperm.xlu1 %2122, %v1704_v12  }
 0x383   : > { %1719 = vperm.xlu1 %2122, %v1706_v49  }
 0x387   : > { %1744 = vperm.xlu1 %2122, %v1735_v51  }
 0x38b   : > { %1763 = vperm.xlu1 %2122, %v1758_v2   ;;  %v2185_v2 = vld [vmem:[%s2354_s25 + $0x8] sm:$0xff] }
 0x38f   : > { %1773 = vperm.xlu1 %2122, %v1760_v52  }
 0x3de   : > { %v1596_v53 = vpop.permute.xlu1 %1595 }
 0x3df   : > { %v1608_v29 = vmul.f32 %v1596_v53, %v2732_v0  ;;  %v1609_v56 = vmul.f32 %v1596_v53, %v2735_v14  ;;  %v1601_v9 = vpop.permute.xlu0 %1600 }
 0x3e0   : > { %v1610_v13 = vmul.f32 %v1601_v9, %v2742_v24  ;;  %v1611_v31 = vmul.f32 %v1601_v9, %v2747_v32 }
 0x3e2   : > { %v1606_v55 = vpop.permute.xlu1 %1605 }
 0x3e3   : > { %v1612_v44 = vmul.f32 %v1606_v55, %v2737_v47  ;;  %v1613_v0 = vmul.f32 %v1606_v55, %v2739_v50  ;;  %v1715_v58 = vpop.permute.xlu0 %1714 }
 0x3e6   : > { %v1623_v28 = vpop.permute.xlu1 %1622 }
 0x3e7   : > { %v1635_v37 = vmul.f32 %v1623_v28, %v1608_v29  ;;  %v1636_v57 = vmul.f32 %v1623_v28, %v1609_v56  ;;  %v1740_v34 = vpop.permute.xlu0 %1739 }
 0x3e9   : > { %v1930_v1 = vmul.f32 -1.442695, %v1635_v37  ;;  %v1931_v33 = vmul.f32 -1.442695, %v1636_v57 }
 0x3ea   : > { %v1628_v3 = vpop.permute.xlu1 %1627 }
 0x3eb   : > { %2136 = vpow2.f32 %v1930_v1  ;;  %v1637_v4 = vmul.f32 %v1628_v3, %v1610_v13  ;;  %v1638_v5 = vmul.f32 %v1628_v3, %v1611_v31  ;;  %v1750_v49 = vpop.permute.xlu0 %1749  ;;  %v2186_v31 = vld [vmem:[%s2354_s25 + $0x10] sm:$0xff] }
 0x3ec   : > { %2138 = vpow2.f32 %v1931_v33 }
 0x3ed   : > { %v1932_v14 = vmul.f32 -1.442695, %v1637_v4  ;;  %v1933_v54 = vmul.f32 -1.442695, %v1638_v5 }
 0x3ee   : > { %v1633_v38 = vpop.permute.xlu1 %1632 }
 0x3ef   : > { %2140 = vpow2.f32 %v1932_v14  ;;  %v1639_v19 = vmul.f32 %v1633_v38, %v1612_v44  ;;  %v1640_v17 = vmul.f32 %v1633_v38, %v1613_v0  ;;  %v1769_v38 = vpop.permute.xlu0 %1768 }
 0x3f0   : > { %2142 = vpow2.f32 %v1933_v54 }
 0x3f1   : > { %v1934_v24 = vmul.f32 -1.442695, %v1639_v19  ;;  %v1935_v32 = vmul.f32 -1.442695, %v1640_v17 }
 0x3f2   : > { %v1686_v10 = vpop.permute.xlu1 %1685 }
 0x3f3   : > { %2144 = vpow2.f32 %v1934_v24 }
 0x3f4   : > { %2146 = vpow2.f32 %v1935_v32 }
 0x3f5   : > { %v2137_v11 = vpop.eup %2136 }
 0x3f6   : > { %v2139_v26 = vpop.eup %2138  ;;  %v1659_v6 = vadd.f32 1.0, %v2137_v11  ;;  %v1691_v7 = vpop.permute.xlu1 %1690 }
 0x3f7   : > { %v1660_v59 = vadd.f32 1.0, %v2139_v26  ;;  %v2189_v26 = vld [vmem:[%s2354_s25 + $0x28] sm:$0xf] }
 0x3f8   : > { %2148 = vrcp.f32 %v1659_v6 }
 0x3f9   : > { %v2141_v47 = vpop.eup %2140  ;;  %2150 = vrcp.f32 %v1660_v59 }
 0x3fa   : > { %v2143_v50 = vpop.eup %2142  ;;  %v1661_v30 = vadd.f32 1.0, %v2141_v47  ;;  %v1696_v8 = vpop.permute.xlu1 %1695 }
 0x3fb   : > { %v1662_v61 = vadd.f32 1.0, %v2143_v50 }
 0x3fc   : > { %2152 = vrcp.f32 %v1661_v30 }
 0x3fd   : > { %v2145_v62 = vpop.eup %2144  ;;  %2154 = vrcp.f32 %v1662_v61 }
 0x3fe   : > { %v2147_v43 = vpop.eup %2146  ;;  %v1663_v18 = vadd.f32 1.0, %v2145_v62  ;;  %v1710_v15 = vpop.permute.xlu1 %1709 }
 0x3ff   : > { %v1664_v22 = vadd.f32 1.0, %v2147_v43 }
 0x400   : > { %2156 = vrcp.f32 %v1663_v18 }
 0x401   : > { %2158 = vrcp.f32 %v1664_v22 }
 0x402   : > { %v2149_v25 = vpop.eup %2148  ;;  %v1720_v42 = vpop.permute.xlu1 %1719 }
 0x403   : > { %v2151_v27 = vpop.eup %2150  ;;  %v1677_v20 = vmul.f32 %v2149_v25, %v1635_v37 }
 0x404   : > { %v1678_v35 = vmul.f32 %v2151_v27, %v1636_v57 }
 0x405   : > { %v1698_v39 = vmul.f32 %v1686_v10, %v1677_v20 }
 0x406   : > { %v2153_v41 = vpop.eup %2152  ;;  %v1699_v16 = vmul.f32 %v1686_v10, %v1678_v35  ;;  %v1745_v45 = vpop.permute.xlu1 %1744 }
 0x407   : > { %v2155_v40 = vpop.eup %2154  ;;  %v1679_v48 = vmul.f32 %v2153_v41, %v1637_v4  ;;  %v1722_v23 = vadd.f32 %v1710_v15, %v1698_v39  ;;  %v2187_v4 = vld [vmem:[%s2354_s25 + $0x18] sm:$0xff] }
 0x408   : > { %v1680_v21 = vmul.f32 %v2155_v40, %v1638_v5  ;;  %v1723_v46 = vadd.f32 %v1710_v15, %v1699_v16 }
 0x409   : > { %v1700_v60 = vmul.f32 %v1691_v7, %v1679_v48  ;;  %v1728_v36 = vadd.f32 %v2184_v63, %v1722_v23 }
 0x40a   : > { %v2157_v12 = vpop.eup %2156  ;;  %v1701_v51 = vmul.f32 %v1691_v7, %v1680_v21  ;;  %v1729_v52 = vadd.f32 %v2185_v2, %v1723_v46  ;;  %v1764_v37 = vpop.permute.xlu1 %1763 }
 0x40b   : > { %v2159_v53 = vpop.eup %2158  ;;  %v1724_v55 = vadd.f32 %v1715_v58, %v1700_v60  ;;  %v1681_v29 = vmul.f32 %v2157_v12, %v1639_v19  ;;  %v1752_v56 = vmul.f32 %v1740_v34, %v1728_v36 }
 0x40c   : > { %v1725_v9 = vadd.f32 %v1715_v58, %v1701_v51  ;;  %v1682_v28 = vmul.f32 %v2159_v53, %v1640_v17  ;;  %v1753_v57 = vmul.f32 %v1740_v34, %v1729_v52  ;;  %v2188_v17 = vld [vmem:[%s2354_s25 + $0x20] sm:$0xf]  ;;  %s2921_s25 = smul.u32 48, %s2923_s16 }
 0x40d   : > { %v1702_v13 = vmul.f32 %v1696_v8, %v1681_v29  ;;  %v1730_v1 = vadd.f32 %v2186_v31, %v1724_v55  ;;  %v1776_v33 = vadd.f32 %v1764_v37, %v1752_v56 }
 0x40e   : > { %v1703_v3 = vmul.f32 %v1696_v8, %v1682_v28  ;;  %v1731_v5 = vadd.f32 %v2187_v4, %v1725_v9  ;;  %v1777_v44 = vadd.f32 %v1764_v37, %v1753_v57  ;;  %v1774_v30 = vpop.permute.xlu1 %1773  ;;  %s482_s27 = scalar_lea.vmem %s2841_s14, %s2921_s25 }
 0x40f   : > { %v1726_v0 = vadd.f32 %v1720_v42, %v1702_v13  ;;  %v1754_v14 = vmul.f32 %v1745_v45, %v1730_v1  ;;  %v1936_v54 = vmul.f32 -1.442695, %v1776_v33 }
 0x410   : > { %v1727_v19 = vadd.f32 %v1720_v42, %v1703_v3  ;;  %v1755_v24 = vmul.f32 %v1745_v45, %v1731_v5  ;;  %v1937_v32 = vmul.f32 -1.442695, %v1777_v44 }
 0x411   : > { %v1732_v10 = vadd.f32 %v2188_v17, %v1726_v0  ;;  %v1778_v11 = vadd.f32 %v1769_v38, %v1754_v14  ;;  %2160 = vpow2.f32 %v1936_v54 }
 0x412   : > { %v1733_v6 = vadd.f32 %v2189_v26, %v1727_v19  ;;  %v1779_v7 = vadd.f32 %v1769_v38, %v1755_v24  ;;  %2162 = vpow2.f32 %v1937_v32 }
 0x413   : > { %v1938_v59 = vmul.f32 -1.442695, %v1778_v11  ;;  %v1756_v47 = vmul.f32 %v1750_v49, %v1732_v10 }
 0x414   : > { %v1939_v50 = vmul.f32 -1.442695, %v1779_v7  ;;  %v1757_v8 = vmul.f32 %v1750_v49, %v1733_v6 }
 0x415   : > { %2164 = vpow2.f32 %v1938_v59  ;;  %v1780_v61 = vadd.f32 %v1774_v30, %v1756_v47 }
 0x416   : > { %2166 = vpow2.f32 %v1939_v50  ;;  %v1781_v62 = vadd.f32 %v1774_v30, %v1757_v8 }
 0x417   : > { %v1940_v43 = vmul.f32 -1.442695, %v1780_v61 }
 0x418   : > { %v1941_v58 = vmul.f32 -1.442695, %v1781_v62 }
 0x419   : > { %2168 = vpow2.f32 %v1940_v43 }
 0x41a   : > { %2170 = vpow2.f32 %v1941_v58 }
 0x41b   : > { %v2161_v18 = vpop.eup %2160 }
 0x41c   : > { %v2163_v15 = vpop.eup %2162  ;;  %v1800_v22 = vadd.f32 1.0, %v2161_v18 }
 0x41d   : > { %v1801_v25 = vadd.f32 1.0, %v2163_v15 }
 0x41e   : > { %2172 = vrcp.f32 %v1800_v22 }
 0x41f   : > { %v2165_v42 = vpop.eup %2164  ;;  %2174 = vrcp.f32 %v1801_v25 }
 0x420   : > { %v2167_v27 = vpop.eup %2166  ;;  %v1802_v20 = vadd.f32 1.0, %v2165_v42 }
 0x421   : > { %v1803_v34 = vadd.f32 1.0, %v2167_v27 }
 0x422   : > { %2176 = vrcp.f32 %v1802_v20 }
 0x423   : > { %v2169_v35 = vpop.eup %2168  ;;  %2178 = vrcp.f32 %v1803_v34 }
 0x424   : > { %v2171_v39 = vpop.eup %2170  ;;  %v1804_v41 = vadd.f32 1.0, %v2169_v35 }
 0x425   : > { %v1805_v16 = vadd.f32 1.0, %v2171_v39 }
 0x426   : > { %2180 = vrcp.f32 %v1804_v41 }
 0x427   : > { %2182 = vrcp.f32 %v1805_v16 }
 0x428   : > { %v2173_v45 = vpop.eup %2172 }
 0x429   : > { %v2175_v40 = vpop.eup %2174  ;;  %v1818_v48 = vmul.f32 %v2173_v45, %v1776_v33 }
 0x42a   : > { %v1819_v23 = vmul.f32 %v2175_v40, %v1777_v44 }
 0x42b   : > { %1824 = vst [vmem:[%s482_s27] sm:$0xff] %v1818_v48 }
 0x42c   : > { %v2177_v21 = vpop.eup %2176  ;;  %1825 = vst [vmem:[%s482_s27 + $0x8] sm:$0xff] %v1819_v23 }
 0x42d   : > { %v2179_v46 = vpop.eup %2178  ;;  %v1820_v60 = vmul.f32 %v2177_v21, %v1778_v11 }
 0x42e   : > { %v1821_v63 = vmul.f32 %v2179_v46, %v1779_v7 }
 0x42f   : > { %1826 = vst [vmem:[%s482_s27 + $0x10] sm:$0xff] %v1820_v60 }
 0x430   : > { %v2181_v36 = vpop.eup %2180  ;;  %1827 = vst [vmem:[%s482_s27 + $0x18] sm:$0xff] %v1821_v63 }
 0x431   : > { %v2183_v12 = vpop.eup %2182  ;;  %v1822_v49 = vmul.f32 %v2181_v36, %v1780_v61 }
 0x432   : > { %v1823_v51 = vmul.f32 %v2183_v12, %v1781_v62 }
 0x433   : > { %1828 = vst [vmem:[%s482_s27 + $0x20] sm:$0xf] %v1822_v49 }
 0x434   : > { %1829 = vst [vmem:[%s482_s27 + $0x28] sm:$0xf] %v1823_v51 }
 0x435 PF: > { %s26_s15 = sadd.s32 1, %s2215_s15  }
 0x436   : > { %p23_p1 = scmp.ge.s32.totalorder %s26_s15, 4  }
 0x438   :  { %25 = sbr.rel (!%p23_p1) target bundleno = 3 (0x3), region = 111 }
 0x43f   :  { %1851 = vsyncpa [#allocation4], 1 }
 0x440   :  { %1853 = vsyncpa [#allocation4 + $0x1], 1 }

</bundles_post_ra>
